<compile_context>
chip_gen: v6e
topology: v6e:2x2x1
jax: 0.10.0
libtpu: 0.0.40
codegen_flags: <defaults>
</compile_context>

<pallas_src>
import functools

import jax
import jax.numpy as jnp
from jax.experimental import pallas as pl
from jax.experimental.pallas import tpu as pltpu


_BN_EPS = 1e-5
_LANE = 128
_SUBLANE_BF16 = 16          # a bf16 vreg holds [16, 128] -> 16-sublane alignment
_MIN_GRID_STEPS = 4         # keep both v7x TensorCores busy + give pipeline depth


def _round_up(n, m):
    return ((n + m - 1) // m) * m


def _divisors(n):
    return [d for d in range(1, n + 1) if n % d == 0]


# ---------------------------------------------------------------------------
# Capability probes (tiny one-off kernels, run once at import).  They keep the
# script runnable across JAX/libtpu versions: if a feature is unavailable we
# fall back to a slower-but-correct path instead of failing to compile.
# ---------------------------------------------------------------------------
def _probe_vmem_capacity():
    try:
        return int(pltpu.get_tpu_info().vmem_capacity_bytes)
    except Exception:
        return 64 * 1024 * 1024          # conservative (v7x-sized) default


def _probe_buffered1():
    """pipeline_mode=pl.Buffered(1) on a resident (constant index map) operand."""
    try:
        def k(x_ref, w_ref, o_ref):
            o_ref[...] = x_ref[...] + w_ref[...]

        f = pl.pallas_call(
            k,
            out_shape=jax.ShapeDtypeStruct((16, 128), jnp.float32),
            grid=(2,),
            in_specs=[
                pl.BlockSpec((8, 128), lambda i: (i, 0)),
                pl.BlockSpec((8, 128), lambda i: (0, 0),
                             pipeline_mode=pl.Buffered(1)),
            ],
            out_specs=pl.BlockSpec((8, 128), lambda i: (i, 0)),
        )
        y = jax.block_until_ready(f(jnp.ones((16, 128), jnp.float32),
                                    jnp.ones((8, 128), jnp.float32)))
        return bool(jnp.all(y == 2.0))
    except Exception:
        return False


def _probe_element_windows():
    """Overlapping element-offset row windows via pl.Element in a BlockSpec."""
    try:
        Hp, rows, th, Wpp, C = 18, 10, 8, 32, 128

        def k(x_ref, o_ref):
            o_ref[...] = x_ref[:, 1:1 + th, :, :]

        base = jnp.arange(2 * Hp, dtype=jnp.float32).reshape(2, Hp, 1, 1)
        x = jnp.broadcast_to(base, (2, Hp, Wpp, C)).astype(jnp.bfloat16)
        f = pl.pallas_call(
            k,
            out_shape=jax.ShapeDtypeStruct((2, th, Wpp, C), jnp.bfloat16),
            grid=(2,),
            in_specs=[pl.BlockSpec((1, pl.Element(rows), Wpp, C),
                                   lambda g: (g, g * th, 0, 0))],
            out_specs=pl.BlockSpec((1, th, Wpp, C), lambda g: (g, 0, 0, 0)),
            compiler_params=pltpu.CompilerParams(
                dimension_semantics=("parallel",)),
        )
        y = jax.block_until_ready(f(x))
        return bool(jnp.array_equal(y[1], x[1, th + 1:th + 1 + th]))
    except Exception:
        return False


def _probe_roll_mode():
    """Determine pltpu.roll's shift convention on bf16 ('+' == like jnp.roll)."""
    try:
        n = 32

        def k(x_ref, o_ref):
            o_ref[...] = pltpu.roll(x_ref[...], shift=1, axis=0)

        base = jnp.arange(n, dtype=jnp.float32).reshape(n, 1)
        x = jnp.broadcast_to(base, (n, 128)).astype(jnp.bfloat16)
        y = jax.block_until_ready(
            pl.pallas_call(
                k, out_shape=jax.ShapeDtypeStruct((n, 128), jnp.bfloat16))(x))
        if bool(y[1, 0] == x[0, 0]) and bool(y[0, 0] == x[n - 1, 0]):
            return "+"          # y[i] = x[i - shift]   (jnp.roll convention)
        if bool(y[0, 0] == x[1, 0]) and bool(y[n - 1, 0] == x[0, 0]):
            return "-"          # y[i] = x[i + shift]
        return None
    except Exception:
        return None


_VMEM_CAP = _probe_vmem_capacity()
_BUFFERED1_OK = _probe_buffered1()
_ELEMENT_OK = _probe_element_windows()
_ROLL_MODE = _probe_roll_mode()


def _wbuf_copies():
    return 1 if _BUFFERED1_OK else 2


def _resident_spec(block_shape):
    """BlockSpec for an operand whose block never changes across the grid
    (weights / bias): constant index map -> fetched once; Buffered(1) drops the
    unused second pipeline buffer (matters for the ~9 MiB 3x3 weight slab)."""
    index_map = lambda *_: (0,) * len(block_shape)
    if _BUFFERED1_OK:
        return pl.BlockSpec(block_shape, index_map, pipeline_mode=pl.Buffered(1))
    return pl.BlockSpec(block_shape, index_map)


def _choose_tile(candidates, n_units, step_bytes, budget, min_steps):
    """Largest candidate tile whose per-step working set fits `budget`; shrink
    further (if possible) until the grid has at least `min_steps` steps."""
    fits = [c for c in candidates if step_bytes(c) <= budget] or [min(candidates)]
    want = min(min_steps, n_units)
    good = [c for c in fits if n_units // c >= want]
    return max(good) if good else min(fits)


def _vmem_limit(step_bytes_val):
    return int(min(_VMEM_CAP * 0.9,
                   max(step_bytes_val * 1.5, 32 * 1024 * 1024)))


# ---------------------------------------------------------------------------
# 1x1 Conv + folded BN + ReLU : pure row-tiled matmul (lane-dense).
# ---------------------------------------------------------------------------
def _conv1x1_bn_relu(x_nhwc, w_hwio, bias):
    """x: (N,H,W,Cx), Cx == Cin or Cin padded to 128 (pad channels == 0).
    Returns (N,H,W,Cout_p) bf16 with exactly-zero pad channels (zero-padded
    weights + zero pad bias + ReLU(0)=0 keeps the invariant for the next layer)."""
    N, H, W, cx = x_nhwc.shape
    cin, cout = int(w_hwio.shape[2]), int(w_hwio.shape[3])
    cin_p, cout_p = _round_up(cin, _LANE), _round_up(cout, _LANE)
    assert cx in (cin, cin_p), (cx, cin, cin_p)

    x = x_nhwc.astype(jnp.bfloat16)
    if cx < cin_p:
        x = jnp.pad(x, ((0, 0), (0, 0), (0, 0), (0, cin_p - cx)))
    R = N * H * W
    x2 = x.reshape(R, cin_p)                       # leading-dim merge: free

    w_full = jnp.zeros((cin_p, cout_p), jnp.float32)
    w_full = w_full.at[:cin, :cout].set(w_hwio[0, 0])
    w_mat = w_full.astype(jnp.bfloat16)
    b_row = jnp.zeros((1, cout_p), jnp.float32).at[0, :cout].set(bias)

    budget = _VMEM_CAP // 4
    w_bytes = cin_p * cout_p * 2 * _wbuf_copies()

    def step_bytes(tm):
        return (w_bytes + cout_p * 4 + (1 << 20)
                + 2 * tm * cin_p * 2              # double-buffered input tile
                + 2 * tm * cout_p * 2             # double-buffered output tile
                + tm * cout_p * 4)                # f32 epilogue temporary

    cands = [d for d in _divisors(R) if (d % 8 == 0 and d <= 4096) or d == R]
    tm = _choose_tile(cands, R, step_bytes, budget, _MIN_GRID_STEPS)

    def kernel(x_ref, w_ref, b_ref, o_ref):
        acc = jnp.dot(x_ref[...], w_ref[...], preferred_element_type=jnp.float32)
        o_ref[...] = jnp.maximum(acc + b_ref[...], 0.0).astype(o_ref.dtype)

    out = pl.pallas_call(
        kernel,
        out_shape=jax.ShapeDtypeStruct((R, cout_p), jnp.bfloat16),
        grid=(R // tm,),
        in_specs=[
            pl.BlockSpec((tm, cin_p), lambda i: (i, 0)),
            _resident_spec((cin_p, cout_p)),
            _resident_spec((1, cout_p)),
        ],
        out_specs=pl.BlockSpec((tm, cout_p), lambda i: (i, 0)),
        compiler_params=pltpu.CompilerParams(
            dimension_semantics=("parallel",),
            vmem_limit_bytes=_vmem_limit(step_bytes(tm))),
        cost_estimate=pl.CostEstimate(
            flops=int(2 * R * cin * cout), transcendentals=0,
            bytes_accessed=int(R * cin_p * 2 + cin_p * cout_p * 2
                               + R * cout_p * 2)),
    )(x2, w_mat, b_row)
    return out.reshape(N, H, W, cout_p)


# ---------------------------------------------------------------------------
# KxK (stride 1, "same") Conv + folded BN + ReLU : per-tap accumulated matmuls.
# ---------------------------------------------------------------------------
def _conv3x3_bn_relu(x_nhwc, w_hwio, bias):
    N, H, W, cx = x_nhwc.shape
    K = int(w_hwio.shape[0])
    pad = (K - 1) // 2
    cin, cout = int(w_hwio.shape[2]), int(w_hwio.shape[3])
    cin_p, cout_p = _round_up(cin, _LANE), _round_up(cout, _LANE)
    assert cx in (cin, cin_p), (cx, cin, cin_p)

    # Pad channels to a lane multiple and padded-width to a 16-sublane multiple
    # so every in-kernel reshape/slice is layout preserving (no relayouts).
    Wpp = _round_up(W + 2 * pad, _SUBLANE_BF16)
    Hp = H + 2 * pad
    x = x_nhwc.astype(jnp.bfloat16)
    if cx < cin_p:
        x = jnp.pad(x, ((0, 0), (0, 0), (0, 0), (0, cin_p - cx)))
    xp = jnp.pad(x, ((0, 0), (pad, pad), (pad, Wpp - W - pad), (0, 0)))

    # Tap-major weights: w_mat[dy*K+dx] is the (cin_p, cout_p) slab of tap (dy,dx).
    w_full = jnp.zeros((K, K, cin_p, cout_p), jnp.float32)
    w_full = w_full.at[:, :, :cin, :cout].set(w_hwio)
    w_mat = w_full.astype(jnp.bfloat16).reshape(K * K, cin_p, cout_p)
    b_row = jnp.zeros((1, cout_p), jnp.float32).at[0, :cout].set(bias)

    # Generation-aware row-tile selection (target ~vmem_capacity/4 per step).
    budget = _VMEM_CAP // 4
    w_bytes = K * K * cin_p * cout_p * 2 * _wbuf_copies()

    def step_bytes(th):
        rows = th + 2 * pad
        return (w_bytes + cout_p * 4 + (1 << 20)
                + 2 * rows * Wpp * cin_p * 2      # double-buffered halo tile
                + rows * Wpp * cin_p * 2          # rolled copy of the slab
                + th * Wpp * cout_p * 4           # f32 accumulator
                + 2 * th * W * cout_p * 2)        # double-buffered output tile

    th = _choose_tile(_divisors(H), N * H, step_bytes, budget, _MIN_GRID_STEPS)
    n_tiles = H // th
    rows = th + 2 * pad
    steps = N * n_tiles
    slab_rows = rows * Wpp

    def _shift_rows(slab, dx):
        # result[j] = slab[(j + dx) % slab_rows]: brings input column c+dx under
        # output column c.  Wrapped rows only land in output columns >= W,
        # which are dropped before the store.
        if dx == 0:
            return slab
        if _ROLL_MODE == "+":
            return pltpu.roll(slab, shift=slab_rows - dx, axis=0)
        if _ROLL_MODE == "-":
            return pltpu.roll(slab, shift=dx, axis=0)
        return jnp.concatenate([slab[dx:], slab[:dx]], axis=0)  # slow fallback

    def kernel(x_ref, w_ref, b_ref, o_ref):
        # (1, rows, Wpp, cin_p) -> (rows*Wpp, cin_p): free (Wpp % 16 == 0).
        xt = x_ref[...].reshape(slab_rows, cin_p)
        acc = None
        for dx in range(K):
            shifted = _shift_rows(xt, dx)                    # XLU; overlaps MXU
            for dy in range(K):
                lhs = shifted[dy * Wpp:(dy + th) * Wpp, :]   # aligned static slice
                part = jnp.dot(lhs, w_ref[dy * K + dx],
                               preferred_element_type=jnp.float32)
                acc = part if acc is None else acc + part
        acc = jnp.maximum(acc + b_ref[...], 0.0)             # f32 epilogue
        out = acc.reshape(th, Wpp, cout_p)[:, :W, :]         # drop pad columns
        o_ref[...] = out[None].astype(o_ref.dtype)

    if _ELEMENT_OK:
        # Overlapping halo row windows straight from the once-padded activation
        # (element-indexed H dim) -- no host-side overlapping-window stack.
        x_in = xp
        x_spec = pl.BlockSpec(
            (1, pl.Element(rows), Wpp, cin_p),
            lambda g: (g // n_tiles, (g % n_tiles) * th, 0, 0))
    else:
        # Fallback only: materialize overlapping windows host side.
        if n_tiles == 1:
            x_in = xp
        else:
            x_in = jnp.stack(
                [xp[:, i * th:i * th + rows] for i in range(n_tiles)], axis=1
            ).reshape(steps, rows, Wpp, cin_p)
        x_spec = pl.BlockSpec((1, rows, Wpp, cin_p), lambda g: (g, 0, 0, 0))

    out = pl.pallas_call(
        kernel,
        out_shape=jax.ShapeDtypeStruct((steps, th, W, cout_p), jnp.bfloat16),
        grid=(steps,),
        in_specs=[
            x_spec,
            _resident_spec((K * K, cin_p, cout_p)),
            _resident_spec((1, cout_p)),
        ],
        out_specs=pl.BlockSpec((1, th, W, cout_p), lambda g: (g, 0, 0, 0)),
        compiler_params=pltpu.CompilerParams(
            dimension_semantics=("parallel",),
            vmem_limit_bytes=_vmem_limit(step_bytes(th))),
        cost_estimate=pl.CostEstimate(
            flops=int(2 * N * H * W * K * K * cin * cout), transcendentals=0,
            bytes_accessed=int(N * Hp * Wpp * cin_p * 2
                               + K * K * cin_p * cout_p * 2
                               + N * H * W * cout_p * 2)),
    )(x_in, w_mat, b_row)
    return out.reshape(N, H, W, cout_p)


# ---------------------------------------------------------------------------
# Parameters (deterministic) + BN folding + forward.
# ---------------------------------------------------------------------------
def init_basic_conv(key, cin, cout, ksize):
    kw, kb, kg, kbe, km, kv = jax.random.split(key, 6)
    fan_in = cin * ksize * ksize
    return dict(
        w=jax.random.normal(kw, (ksize, ksize, cin, cout), jnp.float32)
        / jnp.sqrt(jnp.float32(fan_in)),
        b=0.1 * jax.random.normal(kb, (cout,), jnp.float32),
        gamma=1.0 + 0.1 * jax.random.normal(kg, (cout,), jnp.float32),
        beta=0.1 * jax.random.normal(kbe, (cout,), jnp.float32),
        mean=0.1 * jax.random.normal(km, (cout,), jnp.float32),
        var=jnp.abs(jax.random.normal(kv, (cout,), jnp.float32)) + 0.5,
        ksize=ksize,
    )


def fold_bn(p):
    scale = p["gamma"] / jnp.sqrt(p["var"] + _BN_EPS)
    w_f = p["w"] * scale[None, None, None, :]
    b_f = (p["b"] - p["mean"]) * scale + p["beta"]
    return w_f, b_f


def init_fpn_topdown(key, in_channels, out_channels):
    plan = [
        (in_channels, out_channels, 1),
        (out_channels, out_channels * 2, 3),
        (out_channels * 2, out_channels, 1),
        (out_channels, out_channels * 2, 3),
        (out_channels * 2, out_channels, 1),
    ]
    keys = jax.random.split(key, len(plan))
    return [init_basic_conv(k, ci, co, ks) for k, (ci, co, ks) in zip(keys, plan)]


def fpn_topdown_forward(params, x_nchw):
    """x_nchw: (N, C_in, H, W) f32 -> (N, out_channels, H, W) f32."""
    x = jnp.transpose(x_nchw, (0, 2, 3, 1)).astype(jnp.float32)   # NCHW -> NHWC
    for p in params:
        w_f, b_f = fold_bn(p)
        if p["ksize"] == 1:
            x = _conv1x1_bn_relu(x, w_f, b_f)
        else:
            x = _conv3x3_bn_relu(x, w_f, b_f)
    cout = int(params[-1]["w"].shape[3])
    x = x[..., :cout].astype(jnp.float32)                         # drop pad chans
    return jnp.transpose(x, (0, 3, 1, 2))                         # NHWC -> NCHW


# ---------------------------------------------------------------------------
# References.
#  A) "mixed": same precision path as the kernel (bf16 in / f32 accumulate,
#     folded BN, bf16 inter-layer storage) via lax.conv -> tight bound.
#  B) full f32, unfolded BN -> loose sanity bound (bf16 quantization error).
# ---------------------------------------------------------------------------
def fpn_topdown_ref_mixed(params, x_nchw):
    x = jnp.transpose(x_nchw, (0, 2, 3, 1)).astype(jnp.float32)
    for p in params:
        w_f, b_f = fold_bn(p)
        pad = (p["ksize"] - 1) // 2
        xb = x.astype(jnp.bfloat16).astype(jnp.float32)
        wb = w_f.astype(jnp.bfloat16).astype(jnp.float32)
        y = jax.lax.conv_general_dilated(
            xb, wb, (1, 1), ((pad, pad), (pad, pad)),
            dimension_numbers=("NHWC", "HWIO", "NHWC"),
            precision=jax.lax.Precision.HIGHEST)
        y = jnp.maximum(y + b_f, 0.0)
        x = y.astype(jnp.bfloat16).astype(jnp.float32)
    return jnp.transpose(x, (0, 3, 1, 2))


def fpn_topdown_ref_f32(params, x_nchw):
    x = jnp.transpose(x_nchw, (0, 2, 3, 1)).astype(jnp.float32)
    for p in params:
        pad = (p["ksize"] - 1) // 2
        y = jax.lax.conv_general_dilated(
            x, p["w"], (1, 1), ((pad, pad), (pad, pad)),
            dimension_numbers=("NHWC", "HWIO", "NHWC"),
            precision=jax.lax.Precision.HIGHEST) + p["b"]
        y = (y - p["mean"]) / jnp.sqrt(p["var"] + _BN_EPS) * p["gamma"] + p["beta"]
        x = jnp.maximum(y, 0.0)
    return jnp.transpose(x, (0, 3, 1, 2))


if __name__ == "__main__":
    key = jax.random.PRNGKey(0)
    k_param, k_x = jax.random.split(key)

    N, C_IN, H, W = 2, 4, 16, 16
    OUT_CHANNELS = 8

    x = jax.random.normal(k_x, (N, C_IN, H, W), jnp.float32)
    params = init_fpn_topdown(k_param, C_IN, OUT_CHANNELS)

    fwd = jax.jit(functools.partial(fpn_topdown_forward, params))
    out = jax.block_until_ready(fwd(x))
    assert out.shape == (N, OUT_CHANNELS, H, W), out.shape

    # Check A (tight): same bf16-in / f32-accumulate path via lax.conv.
    ref_mixed = jax.block_until_ready(fpn_topdown_ref_mixed(params, x))
    err_a = float(jnp.max(jnp.abs(out - ref_mixed)))
    assert err_a < 1e-2, ("mixed-precision reference mismatch", err_a)

    # Check B (sanity): full-f32 reference with unfolded BN; bound accounts for
    # bf16 activation/weight quantization across 5 layers.
    ref_f32 = jax.block_until_ready(fpn_topdown_ref_f32(params, x))
    scale = float(jnp.max(jnp.abs(ref_f32))) + 1e-6
    err_b = float(jnp.max(jnp.abs(out - ref_f32)))
    assert err_b <= 0.1 * scale, ("f32 reference sanity check failed", err_b, scale)

    print("KERNEL_OK")
</pallas_src>

<mosaic_0001>
module attributes {stable_mosaic.version = 11 : i64} {
  func.func @k(%arg0: i32, %arg1: memref<8x128xf32, #tpu.memory_space<vmem>>, %arg2: memref<8x128xf32, #tpu.memory_space<vmem>>, %arg3: memref<8x128xf32, #tpu.memory_space<vmem>>) attributes {dimension_semantics = [#tpu.dimension_semantics<arbitrary>], iteration_bounds = array<i64: 2>, scalar_prefetch = 0 : i64, scratch_operands = 0 : i64, tpu.core_type = #tpu.core_type<tc>, window_params = [{transform_indices = @transform_0, window_bounds = array<i64: 8, 128>}, {pipeline_mode = #tpu.pipeline_mode<synchronous>, transform_indices = @transform_1, window_bounds = array<i64: 8, 128>}, {transform_indices = @transform_2, window_bounds = array<i64: 8, 128>}]} {
    %c0 = arith.constant 0 : index
    %c0_0 = arith.constant 0 : index
    %0 = vector.load %arg1[%c0, %c0_0] : memref<8x128xf32, #tpu.memory_space<vmem>>, vector<8x128xf32>
    %c0_1 = arith.constant 0 : index
    %c0_2 = arith.constant 0 : index
    %1 = vector.load %arg2[%c0_1, %c0_2] : memref<8x128xf32, #tpu.memory_space<vmem>>, vector<8x128xf32>
    %2 = arith.addf %0, %1 : vector<8x128xf32>
    %c0_3 = arith.constant 0 : index
    %c0_4 = arith.constant 0 : index
    %3 = vector.load %arg3[%c0_3, %c0_4] : memref<8x128xf32, #tpu.memory_space<vmem>>, vector<8x128xf32>
    tpu.vector_store %arg3[%c0_3, %c0_4], %2 {strides = array<i32>} : memref<8x128xf32, #tpu.memory_space<vmem>>, vector<8x128xf32>,
    return
  }
  func.func @transform_0(%arg0: i32) -> (i32, i32) {
    %c0_i32 = arith.constant 0 : i32
    %c0_i32_0 = arith.constant 0 : i32
    return %arg0, %c0_i32 : i32, i32
  }
  func.func @transform_1(%arg0: i32) -> (i32, i32) {
    %c0_i32 = arith.constant 0 : i32
    %c0_i32_0 = arith.constant 0 : i32
    %c0_i32_1 = arith.constant 0 : i32
    return %c0_i32, %c0_i32_0 : i32, i32
  }
  func.func @transform_2(%arg0: i32) -> (i32, i32) {
    %c0_i32 = arith.constant 0 : i32
    %c0_i32_0 = arith.constant 0 : i32
    return %arg0, %c0_i32 : i32, i32
  }
}

module attributes {stable_mosaic.version = 11 : i64} {
  func.func @k(%arg0: memref<32x128xbf16, #tpu.memory_space<vmem>>, %arg1: memref<32x128xbf16, #tpu.memory_space<vmem>>) attributes {dimension_semantics = [], scalar_prefetch = 0 : i64, scratch_operands = 0 : i64, tpu.core_type = #tpu.core_type<tc>} {
    %c0 = arith.constant 0 : index
    %c0_0 = arith.constant 0 : index
    %0 = vector.load %arg0[%c0, %c0_0] : memref<32x128xbf16, #tpu.memory_space<vmem>>, vector<32x128xbf16>
    %c1_i32 = arith.constant 1 : i32
    %1 = tpu.dynamic_rotate %0 by %c1_i32 dim 0 : vector<32x128xbf16>, i32 -> vector<32x128xbf16>
    %c0_1 = arith.constant 0 : index
    %c0_2 = arith.constant 0 : index
    %2 = vector.load %arg1[%c0_1, %c0_2] : memref<32x128xbf16, #tpu.memory_space<vmem>>, vector<32x128xbf16>
    tpu.vector_store %arg1[%c0_1, %c0_2], %1 {strides = array<i32>} : memref<32x128xbf16, #tpu.memory_space<vmem>>, vector<32x128xbf16>,
    return
  }
}

module attributes {stable_mosaic.version = 11 : i64} {
  func.func @kernel(%arg0: i32, %arg1: memref<128x128xbf16, #tpu.memory_space<vmem>>, %arg2: memref<128x128xbf16, #tpu.memory_space<vmem>>, %arg3: memref<1x128xf32, #tpu.memory_space<vmem>>, %arg4: memref<128x128xbf16, #tpu.memory_space<vmem>>) attributes {dimension_semantics = [#tpu.dimension_semantics<parallel>], iteration_bounds = array<i64: 4>, scalar_prefetch = 0 : i64, scratch_operands = 0 : i64, tpu.core_type = #tpu.core_type<tc>, window_params = [{transform_indices = @transform_0, window_bounds = array<i64: 128, 128>}, {pipeline_mode = #tpu.pipeline_mode<synchronous>, transform_indices = @transform_1, window_bounds = array<i64: 128, 128>}, {pipeline_mode = #tpu.pipeline_mode<synchronous>, transform_indices = @transform_2, window_bounds = array<i64: 1, 128>}, {transform_indices = @transform_3, window_bounds = array<i64: 128, 128>}]} {
    %c0 = arith.constant 0 : index
    %c0_0 = arith.constant 0 : index
    %0 = vector.load %arg1[%c0, %c0_0] : memref<128x128xbf16, #tpu.memory_space<vmem>>, vector<128x128xbf16>
    %c0_1 = arith.constant 0 : index
    %c0_2 = arith.constant 0 : index
    %1 = vector.load %arg2[%c0_1, %c0_2] : memref<128x128xbf16, #tpu.memory_space<vmem>>, vector<128x128xbf16>
    %cst = arith.constant dense<0.000000e+00> : vector<128x128xf32>
    %2 = tpu.matmul %0, %1, %cst {dimension_numbers = #tpu.dot_dimension_numbers<[1], [0], [0], [1], [0, 0, 1, 1], [], []>} : vector<128x128xbf16>, vector<128x128xbf16>, vector<128x128xf32> -> vector<128x128xf32>
    %c0_3 = arith.constant 0 : index
    %c0_4 = arith.constant 0 : index
    %3 = vector.load %arg3[%c0_3, %c0_4] : memref<1x128xf32, #tpu.memory_space<vmem>>, vector<1x128xf32>
    %4 = vector.broadcast %3 : vector<1x128xf32> to vector<128x128xf32>
    %5 = arith.addf %2, %4 : vector<128x128xf32>
    %cst_5 = arith.constant 0.000000e+00 : f32
    %6 = vector.broadcast %cst_5 : f32 to vector<128x128xf32>
    %7 = arith.maximumf %5, %6 : vector<128x128xf32>
    %8 = arith.truncf %7 : vector<128x128xf32> to vector<128x128xbf16>
    %c0_6 = arith.constant 0 : index
    %c0_7 = arith.constant 0 : index
    %9 = vector.load %arg4[%c0_6, %c0_7] : memref<128x128xbf16, #tpu.memory_space<vmem>>, vector<128x128xbf16>
    tpu.vector_store %arg4[%c0_6, %c0_7], %8 {strides = array<i32>} : memref<128x128xbf16, #tpu.memory_space<vmem>>, vector<128x128xbf16>,
    return
  }
  func.func @transform_0(%arg0: i32) -> (i32, i32) {
    %c0_i32 = arith.constant 0 : i32
    %c0_i32_0 = arith.constant 0 : i32
    return %arg0, %c0_i32 : i32, i32
  }
  func.func @transform_1(%arg0: i32) -> (i32, i32) {
    %c0_i32 = arith.constant 0 : i32
    %c0_i32_0 = arith.constant 0 : i32
    %c0_i32_1 = arith.constant 0 : i32
    return %c0_i32, %c0_i32_0 : i32, i32
  }
  func.func @transform_2(%arg0: i32) -> (i32, i32) {
    %c0_i32 = arith.constant 0 : i32
    %c0_i32_0 = arith.constant 0 : i32
    %c0_i32_1 = arith.constant 0 : i32
    return %c0_i32, %c0_i32_0 : i32, i32
  }
  func.func @transform_3(%arg0: i32) -> (i32, i32) {
    %c0_i32 = arith.constant 0 : i32
    %c0_i32_0 = arith.constant 0 : i32
    return %arg0, %c0_i32 : i32, i32
  }
}

module attributes {stable_mosaic.version = 11 : i64} {
  func.func @kernel(%arg0: i32, %arg1: memref<1x10x32x128xbf16, #tpu.memory_space<vmem>>, %arg2: memref<9x128x128xbf16, #tpu.memory_space<vmem>>, %arg3: memref<1x128xf32, #tpu.memory_space<vmem>>, %arg4: memref<1x8x16x128xbf16, #tpu.memory_space<vmem>>) attributes {dimension_semantics = [#tpu.dimension_semantics<parallel>], iteration_bounds = array<i64: 4>, scalar_prefetch = 0 : i64, scratch_operands = 0 : i64, tpu.core_type = #tpu.core_type<tc>, window_params = [{transform_indices = @transform_0, window_bounds = array<i64: 1, 10, 32, 128>}, {pipeline_mode = #tpu.pipeline_mode<synchronous>, transform_indices = @transform_1, window_bounds = array<i64: 9, 128, 128>}, {pipeline_mode = #tpu.pipeline_mode<synchronous>, transform_indices = @transform_2, window_bounds = array<i64: 1, 128>}, {transform_indices = @transform_3, window_bounds = array<i64: 1, 8, 16, 128>}]} {
    %c0 = arith.constant 0 : index
    %c0_0 = arith.constant 0 : index
    %c0_1 = arith.constant 0 : index
    %c0_2 = arith.constant 0 : index
    %0 = vector.load %arg1[%c0, %c0_0, %c0_1, %c0_2] : memref<1x10x32x128xbf16, #tpu.memory_space<vmem>>, vector<1x10x32x128xbf16>
    %1 = vector.shape_cast %0 : vector<1x10x32x128xbf16> to vector<320x128xbf16>
    %2 = vector.extract_strided_slice %1 {offsets = [0, 0], sizes = [256, 128], strides = [1, 1]} : vector<320x128xbf16> to vector<256x128xbf16>
    %c0_3 = arith.constant 0 : index
    %c0_4 = arith.constant 0 : index
    %c0_5 = arith.constant 0 : index
    %3 = vector.load %arg2[%c0_3, %c0_4, %c0_5] : memref<9x128x128xbf16, #tpu.memory_space<vmem>>, vector<1x128x128xbf16>
    %4 = vector.shape_cast %3 : vector<1x128x128xbf16> to vector<128x128xbf16>
    %cst = arith.constant dense<0.000000e+00> : vector<256x128xf32>
    %5 = tpu.matmul %2, %4, %cst {dimension_numbers = #tpu.dot_dimension_numbers<[1], [0], [0], [1], [0, 0, 1, 1], [], []>} : vector<256x128xbf16>, vector<128x128xbf16>, vector<256x128xf32> -> vector<256x128xf32>
    %6 = vector.extract_strided_slice %1 {offsets = [32, 0], sizes = [256, 128], strides = [1, 1]} : vector<320x128xbf16> to vector<256x128xbf16>
    %c3 = arith.constant 3 : index
    %c0_6 = arith.constant 0 : index
    %c0_7 = arith.constant 0 : index
    %7 = vector.load %arg2[%c3, %c0_6, %c0_7] : memref<9x128x128xbf16, #tpu.memory_space<vmem>>, vector<1x128x128xbf16>
    %8 = vector.shape_cast %7 : vector<1x128x128xbf16> to vector<128x128xbf16>
    %cst_8 = arith.constant dense<0.000000e+00> : vector<256x128xf32>
    %9 = tpu.matmul %6, %8, %cst_8 {dimension_numbers = #tpu.dot_dimension_numbers<[1], [0], [0], [1], [0, 0, 1, 1], [], []>} : vector<256x128xbf16>, vector<128x128xbf16>, vector<256x128xf32> -> vector<256x128xf32>
    %10 = arith.addf %5, %9 : vector<256x128xf32>
    %11 = vector.extract_strided_slice %1 {offsets = [64, 0], sizes = [256, 128], strides = [1, 1]} : vector<320x128xbf16> to vector<256x128xbf16>
    %c6 = arith.constant 6 : index
    %c0_9 = arith.constant 0 : index
    %c0_10 = arith.constant 0 : index
    %12 = vector.load %arg2[%c6, %c0_9, %c0_10] : memref<9x128x128xbf16, #tpu.memory_space<vmem>>, vector<1x128x128xbf16>
    %13 = vector.shape_cast %12 : vector<1x128x128xbf16> to vector<128x128xbf16>
    %cst_11 = arith.constant dense<0.000000e+00> : vector<256x128xf32>
    %14 = tpu.matmul %11, %13, %cst_11 {dimension_numbers = #tpu.dot_dimension_numbers<[1], [0], [0], [1], [0, 0, 1, 1], [], []>} : vector<256x128xbf16>, vector<128x128xbf16>, vector<256x128xf32> -> vector<256x128xf32>
    %15 = arith.addf %10, %14 : vector<256x128xf32>
    %16 = vector.extract_strided_slice %1 {offsets = [1, 0], sizes = [319, 128], strides = [1, 1]} : vector<320x128xbf16> to vector<319x128xbf16>
    %17 = vector.extract_strided_slice %1 {offsets = [0, 0], sizes = [1, 128], strides = [1, 1]} : vector<320x128xbf16> to vector<1x128xbf16>
    %18 = tpu.concatenate %16, %17 in 0 : vector<319x128xbf16>, vector<1x128xbf16> -> vector<320x128xbf16>
    %19 = vector.extract_strided_slice %18 {offsets = [0, 0], sizes = [256, 128], strides = [1, 1]} : vector<320x128xbf16> to vector<256x128xbf16>
    %c1 = arith.constant 1 : index
    %c0_12 = arith.constant 0 : index
    %c0_13 = arith.constant 0 : index
    %20 = vector.load %arg2[%c1, %c0_12, %c0_13] : memref<9x128x128xbf16, #tpu.memory_space<vmem>>, vector<1x128x128xbf16>
    %21 = vector.shape_cast %20 : vector<1x128x128xbf16> to vector<128x128xbf16>
    %cst_14 = arith.constant dense<0.000000e+00> : vector<256x128xf32>
    %22 = tpu.matmul %19, %21, %cst_14 {dimension_numbers = #tpu.dot_dimension_numbers<[1], [0], [0], [1], [0, 0, 1, 1], [], []>} : vector<256x128xbf16>, vector<128x128xbf16>, vector<256x128xf32> -> vector<256x128xf32>
    %23 = arith.addf %15, %22 : vector<256x128xf32>
    %24 = vector.extract_strided_slice %18 {offsets = [32, 0], sizes = [256, 128], strides = [1, 1]} : vector<320x128xbf16> to vector<256x128xbf16>
    %c4 = arith.constant 4 : index
    %c0_15 = arith.constant 0 : index
    %c0_16 = arith.constant 0 : index
    %25 = vector.load %arg2[%c4, %c0_15, %c0_16] : memref<9x128x128xbf16, #tpu.memory_space<vmem>>, vector<1x128x128xbf16>
    %26 = vector.shape_cast %25 : vector<1x128x128xbf16> to vector<128x128xbf16>
    %cst_17 = arith.constant dense<0.000000e+00> : vector<256x128xf32>
    %27 = tpu.matmul %24, %26, %cst_17 {dimension_numbers = #tpu.dot_dimension_numbers<[1], [0], [0], [1], [0, 0, 1, 1], [], []>} : vector<256x128xbf16>, vector<128x128xbf16>, vector<256x128xf32> -> vector<256x128xf32>
    %28 = arith.addf %23, %27 : vector<256x128xf32>
    %29 = vector.extract_strided_slice %18 {offsets = [64, 0], sizes = [256, 128], strides = [1, 1]} : vector<320x128xbf16> to vector<256x128xbf16>
    %c7 = arith.constant 7 : index
    %c0_18 = arith.constant 0 : index
    %c0_19 = arith.constant 0 : index
    %30 = vector.load %arg2[%c7, %c0_18, %c0_19] : memref<9x128x128xbf16, #tpu.memory_space<vmem>>, vector<1x128x128xbf16>
    %31 = vector.shape_cast %30 : vector<1x128x128xbf16> to vector<128x128xbf16>
    %cst_20 = arith.constant dense<0.000000e+00> : vector<256x128xf32>
    %32 = tpu.matmul %29, %31, %cst_20 {dimension_numbers = #tpu.dot_dimension_numbers<[1], [0], [0], [1], [0, 0, 1, 1], [], []>} : vector<256x128xbf16>, vector<128x128xbf16>, vector<256x128xf32> -> vector<256x128xf32>
    %33 = arith.addf %28, %32 : vector<256x128xf32>
    %34 = vector.extract_strided_slice %1 {offsets = [2, 0], sizes = [318, 128], strides = [1, 1]} : vector<320x128xbf16> to vector<318x128xbf16>
    %35 = vector.extract_strided_slice %1 {offsets = [0, 0], sizes = [2, 128], strides = [1, 1]} : vector<320x128xbf16> to vector<2x128xbf16>
    %36 = tpu.concatenate %34, %35 in 0 : vector<318x128xbf16>, vector<2x128xbf16> -> vector<320x128xbf16>
    %37 = vector.extract_strided_slice %36 {offsets = [0, 0], sizes = [256, 128], strides = [1, 1]} : vector<320x128xbf16> to vector<256x128xbf16>
    %c2 = arith.constant 2 : index
    %c0_21 = arith.constant 0 : index
    %c0_22 = arith.constant 0 : index
    %38 = vector.load %arg2[%c2, %c0_21, %c0_22] : memref<9x128x128xbf16, #tpu.memory_space<vmem>>, vector<1x128x128xbf16>
    %39 = vector.shape_cast %38 : vector<1x128x128xbf16> to vector<128x128xbf16>
    %cst_23 = arith.constant dense<0.000000e+00> : vector<256x128xf32>
    %40 = tpu.matmul %37, %39, %cst_23 {dimension_numbers = #tpu.dot_dimension_numbers<[1], [0], [0], [1], [0, 0, 1, 1], [], []>} : vector<256x128xbf16>, vector<128x128xbf16>, vector<256x128xf32> -> vector<256x128xf32>
    %41 = arith.addf %33, %40 : vector<256x128xf32>
    %42 = vector.extract_strided_slice %36 {offsets = [32, 0], sizes = [256, 128], strides = [1, 1]} : vector<320x128xbf16> to vector<256x128xbf16>
    %c5 = arith.constant 5 : index
    %c0_24 = arith.constant 0 : index
    %c0_25 = arith.constant 0 : index
    %43 = vector.load %arg2[%c5, %c0_24, %c0_25] : memref<9x128x128xbf16, #tpu.memory_space<vmem>>, vector<1x128x128xbf16>
    %44 = vector.shape_cast %43 : vector<1x128x128xbf16> to vector<128x128xbf16>
    %cst_26 = arith.constant dense<0.000000e+00> : vector<256x128xf32>
    %45 = tpu.matmul %42, %44, %cst_26 {dimension_numbers = #tpu.dot_dimension_numbers<[1], [0], [0], [1], [0, 0, 1, 1], [], []>} : vector<256x128xbf16>, vector<128x128xbf16>, vector<256x128xf32> -> vector<256x128xf32>
    %46 = arith.addf %41, %45 : vector<256x128xf32>
    %47 = vector.extract_strided_slice %36 {offsets = [64, 0], sizes = [256, 128], strides = [1, 1]} : vector<320x128xbf16> to vector<256x128xbf16>
    %c8 = arith.constant 8 : index
    %c0_27 = arith.constant 0 : index
    %c0_28 = arith.constant 0 : index
    %48 = vector.load %arg2[%c8, %c0_27, %c0_28] : memref<9x128x128xbf16, #tpu.memory_space<vmem>>, vector<1x128x128xbf16>
    %49 = vector.shape_cast %48 : vector<1x128x128xbf16> to vector<128x128xbf16>
    %cst_29 = arith.constant dense<0.000000e+00> : vector<256x128xf32>
    %50 = tpu.matmul %47, %49, %cst_29 {dimension_numbers = #tpu.dot_dimension_numbers<[1], [0], [0], [1], [0, 0, 1, 1], [], []>} : vector<256x128xbf16>, vector<128x128xbf16>, vector<256x128xf32> -> vector<256x128xf32>
    %51 = arith.addf %46, %50 : vector<256x128xf32>
    %c0_30 = arith.constant 0 : index
    %c0_31 = arith.constant 0 : index
    %52 = vector.load %arg3[%c0_30, %c0_31] : memref<1x128xf32, #tpu.memory_space<vmem>>, vector<1x128xf32>
    %53 = vector.broadcast %52 : vector<1x128xf32> to vector<256x128xf32>
    %54 = arith.addf %51, %53 : vector<256x128xf32>
    %cst_32 = arith.constant 0.000000e+00 : f32
    %55 = vector.broadcast %cst_32 : f32 to vector<256x128xf32>
    %56 = arith.maximumf %54, %55 : vector<256x128xf32>
    %57 = vector.shape_cast %56 : vector<256x128xf32> to vector<8x32x128xf32>
    %58 = vector.extract_strided_slice %57 {offsets = [0, 0, 0], sizes = [8, 16, 128], strides = [1, 1, 1]} : vector<8x32x128xf32> to vector<8x16x128xf32>
    %59 = vector.shape_cast %58 : vector<8x16x128xf32> to vector<1x8x16x128xf32>
    %60 = arith.truncf %59 : vector<1x8x16x128xf32> to vector<1x8x16x128xbf16>
    %c0_33 = arith.constant 0 : index
    %c0_34 = arith.constant 0 : index
    %c0_35 = arith.constant 0 : index
    %c0_36 = arith.constant 0 : index
    %61 = vector.load %arg4[%c0_33, %c0_34, %c0_35, %c0_36] : memref<1x8x16x128xbf16, #tpu.memory_space<vmem>>, vector<1x8x16x128xbf16>
    tpu.vector_store %arg4[%c0_33, %c0_34, %c0_35, %c0_36], %60 {strides = array<i32>} : memref<1x8x16x128xbf16, #tpu.memory_space<vmem>>, vector<1x8x16x128xbf16>,
    return
  }
  func.func @transform_0(%arg0: i32) -> (i32, i32, i32, i32) {
    %c0_i32 = arith.constant 0 : i32
    %c0_i32_0 = arith.constant 0 : i32
    %c0_i32_1 = arith.constant 0 : i32
    %c0_i32_2 = arith.constant 0 : i32
    return %arg0, %c0_i32, %c0_i32_0, %c0_i32_1 : i32, i32, i32, i32
  }
  func.func @transform_1(%arg0: i32) -> (i32, i32, i32) {
    %c0_i32 = arith.constant 0 : i32
    %c0_i32_0 = arith.constant 0 : i32
    %c0_i32_1 = arith.constant 0 : i32
    %c0_i32_2 = arith.constant 0 : i32
    return %c0_i32, %c0_i32_0, %c0_i32_1 : i32, i32, i32
  }
  func.func @transform_2(%arg0: i32) -> (i32, i32) {
    %c0_i32 = arith.constant 0 : i32
    %c0_i32_0 = arith.constant 0 : i32
    %c0_i32_1 = arith.constant 0 : i32
    return %c0_i32, %c0_i32_0 : i32, i32
  }
  func.func @transform_3(%arg0: i32) -> (i32, i32, i32, i32) {
    %c0_i32 = arith.constant 0 : i32
    %c0_i32_0 = arith.constant 0 : i32
    %c0_i32_1 = arith.constant 0 : i32
    %c0_i32_2 = arith.constant 0 : i32
    return %arg0, %c0_i32, %c0_i32_0, %c0_i32_1 : i32, i32, i32, i32
  }
}

module attributes {stable_mosaic.version = 11 : i64} {
  func.func @kernel(%arg0: i32, %arg1: memref<128x128xbf16, #tpu.memory_space<vmem>>, %arg2: memref<128x128xbf16, #tpu.memory_space<vmem>>, %arg3: memref<1x128xf32, #tpu.memory_space<vmem>>, %arg4: memref<128x128xbf16, #tpu.memory_space<vmem>>) attributes {dimension_semantics = [#tpu.dimension_semantics<parallel>], iteration_bounds = array<i64: 4>, scalar_prefetch = 0 : i64, scratch_operands = 0 : i64, tpu.core_type = #tpu.core_type<tc>, window_params = [{transform_indices = @transform_0, window_bounds = array<i64: 128, 128>}, {pipeline_mode = #tpu.pipeline_mode<synchronous>, transform_indices = @transform_1, window_bounds = array<i64: 128, 128>}, {pipeline_mode = #tpu.pipeline_mode<synchronous>, transform_indices = @transform_2, window_bounds = array<i64: 1, 128>}, {transform_indices = @transform_3, window_bounds = array<i64: 128, 128>}]} {
    %c0 = arith.constant 0 : index
    %c0_0 = arith.constant 0 : index
    %0 = vector.load %arg1[%c0, %c0_0] : memref<128x128xbf16, #tpu.memory_space<vmem>>, vector<128x128xbf16>
    %c0_1 = arith.constant 0 : index
    %c0_2 = arith.constant 0 : index
    %1 = vector.load %arg2[%c0_1, %c0_2] : memref<128x128xbf16, #tpu.memory_space<vmem>>, vector<128x128xbf16>
    %cst = arith.constant dense<0.000000e+00> : vector<128x128xf32>
    %2 = tpu.matmul %0, %1, %cst {dimension_numbers = #tpu.dot_dimension_numbers<[1], [0], [0], [1], [0, 0, 1, 1], [], []>} : vector<128x128xbf16>, vector<128x128xbf16>, vector<128x128xf32> -> vector<128x128xf32>
    %c0_3 = arith.constant 0 : index
    %c0_4 = arith.constant 0 : index
    %3 = vector.load %arg3[%c0_3, %c0_4] : memref<1x128xf32, #tpu.memory_space<vmem>>, vector<1x128xf32>
    %4 = vector.broadcast %3 : vector<1x128xf32> to vector<128x128xf32>
    %5 = arith.addf %2, %4 : vector<128x128xf32>
    %cst_5 = arith.constant 0.000000e+00 : f32
    %6 = vector.broadcast %cst_5 : f32 to vector<128x128xf32>
    %7 = arith.maximumf %5, %6 : vector<128x128xf32>
    %8 = arith.truncf %7 : vector<128x128xf32> to vector<128x128xbf16>
    %c0_6 = arith.constant 0 : index
    %c0_7 = arith.constant 0 : index
    %9 = vector.load %arg4[%c0_6, %c0_7] : memref<128x128xbf16, #tpu.memory_space<vmem>>, vector<128x128xbf16>
    tpu.vector_store %arg4[%c0_6, %c0_7], %8 {strides = array<i32>} : memref<128x128xbf16, #tpu.memory_space<vmem>>, vector<128x128xbf16>,
    return
  }
  func.func @transform_0(%arg0: i32) -> (i32, i32) {
    %c0_i32 = arith.constant 0 : i32
    %c0_i32_0 = arith.constant 0 : i32
    return %arg0, %c0_i32 : i32, i32
  }
  func.func @transform_1(%arg0: i32) -> (i32, i32) {
    %c0_i32 = arith.constant 0 : i32
    %c0_i32_0 = arith.constant 0 : i32
    %c0_i32_1 = arith.constant 0 : i32
    return %c0_i32, %c0_i32_0 : i32, i32
  }
  func.func @transform_2(%arg0: i32) -> (i32, i32) {
    %c0_i32 = arith.constant 0 : i32
    %c0_i32_0 = arith.constant 0 : i32
    %c0_i32_1 = arith.constant 0 : i32
    return %c0_i32, %c0_i32_0 : i32, i32
  }
  func.func @transform_3(%arg0: i32) -> (i32, i32) {
    %c0_i32 = arith.constant 0 : i32
    %c0_i32_0 = arith.constant 0 : i32
    return %arg0, %c0_i32 : i32, i32
  }
}

</mosaic_0001>

<bundles_post_ra>
// kernel: tpu_custom_call.1
= control target key start
LH: loop header
LB: loop body
LE: loop exit
PB: predicated region body
PF: predicated region fallthrough
CT: control target
= control target key end

     0   :  { %7 = vsyncpa [#allocation3], 0  ;;  %s649_s0 = inlined_call_operand.hbm [shape: f32[16,128], index: 0, kind: input, shape index: {}]   ;;  %s650_s1 = inlined_call_operand.hbm [shape: f32[8,128], index: 1, kind: input, shape index: {}]   ;;  %s651_s2 = inlined_call_operand.hbm [shape: f32[16,128], index: 2, kind: output, shape index: {}]  }
   0x1   :  { %9 = vsyncpa [#allocation3 + $0x1], 0 }
   0x2   :  { %10 = vsyncpa [#allocation6], 0 }
   0x3   :  { %11 = vsyncpa [#allocation4], 0 }
   0x4   :  { %13 = vsyncpa [#allocation4 + $0x1], 0  ;;  %s483_s9 = smov 0   ;;  %s485_s10 = smov 0  }
   0x5   :  { %s487_s11 = smov 0   ;;  %s489_s12 = smov 0  }
   0x6 LB: > { %s504_s13 = sadd.s32 4294967295, %s463_s12   ;;  %s270_s14 = sadd.s32 4294967294, %s463_s12   ;;  %s463_s12 = sphi %s489_s12, %s674_s12   ;;  %s459_s11 = sphi %s487_s11, %s673_s11   ;;  %s455_s10 = sphi %s485_s10, %s672_s10   ;;  %s451_s9 = sphi %s483_s9, %s671_s9  }
   0x7   : > { %p39_p0 = scmp.ne.s32.totalorder %s455_s10, %s451_s9  ;;  %p652_p1 = scmp.eq.s32.totalorder %s504_s13, 0 }
   0x8   : > { %p90_p3 = scmp.eq.s32.totalorder %s270_s14, 1  ;;  %p271_p5 = scmp.ge.s32.totalorder %s463_s12, 1 }
   0x9   : > { %p513_p4 = por %p652_p1, %p39_p0  ;;  %p97_p7 = scmp.lt.s32.totalorder %s463_s12, 3 }
   0xa   : > { %p518_p6 = por %p90_p3, %p39_p0  ;;  %s465_s18 = smov [#allocation5]  }
   0xb   : > { %s656_s15 = scalar_select %p513_p4, 1, 0 }
   0xc   : > { %s657_s16 = scalar_select %p518_p6, 1, 0 }
   0xd   : > { %p523_p8 = pnand %p271_p5, %p97_p7  ;;  %s110_s19 = sshll.u32 %s465_s18, 4  ;;  %s111_s19 = int_to_ptr.vmem [resolvable:$true] %s110_s19 }
   0xe   : > { %s531_s20 = sadd.s32 1, %s463_s12   ;;  %s26_s24 = sadd.s32 1, %s459_s11 }
   0xf   : > { %s658_s17 = scalar_select %p523_p8, 1, 0 }
  0x10   : > { %p292_p10 = pneg %p523_p8  ;;  %s23_s22 = ssub.s32 %s463_s12, %s531_s20 }
  0x11   : > { %p541_p12 = scmp.eq.s32.totalorder %s23_s22, 0  ;;  %p33_p13 = scmp.ne.s32.totalorder %s459_s11, %s455_s10 }
  0x12   : > { %p535_p11 = pnand %p292_p10, %p652_p1  ;;  %s352_s25 = scalar_lea.vmem %s111_s19, 128 }
  0x13   : > { %p353_p3 = scmp.ne.s32.totalorder %s111_s19, %s352_s25  ;;  %p360_p9 = scmp.lt.s32.totalorder %s111_s19, %s111_s19 }
  0x14   : > { %p343_p0 = pneg %p535_p11  ;;  %p361_p2 = scmp.lt.s32.totalorder %s352_s25, %s352_s25 }
  0x16   : > { %p355_p5 = pnand %p353_p3, %p343_p0  ;;  %p362_p10 = por %p361_p2, %p360_p9 }
  0x18   : > { %p356_p7 = pneg %p355_p5 }
  0x1a   : > { %p363_p1 = pnand %p362_p10, %p356_p7 }
  0x1c   : > { %366 = shalt.err (!%p363_p1)
}
  0x1d   : > { %295 = dma.hbm_to_vmem [thread:$0]  (!%p535_p11), %s650_s1, 128, %s111_s19, [#allocation6]  }
  0x1e   : > { %s558_s28 = scalar_select %p541_p12, %s459_s11, %s26_s24  }
  0x1f   : > { %p34_p1 = scmp.eq.s32.totalorder %s463_s12, 0  ;;  %p661_p2 = scmp.eq.s32.totalorder %s504_s13, 1 }
  0x20   : > { %p305_p0 = scmp.lt.s32.totalorder %s463_s12, 2  ;;  %s121_s30 = sand.u32 1, %s459_s11  }
  0x21   : > { %p566_p9 = por %p661_p2, %p33_p13  ;;  %p35_p3 = por %p34_p1, %p33_p13 }
  0x22   : > { %s274_s3 = sshll.u32 %s121_s30, 3  ;;  %s275_s4 = sshll.u32 %s463_s12, 7 }
  0x23   : > { %s662_s29 = scalar_select %p566_p9, 1, 0 }
  0x24   : > { %s579_s7 = scalar_lea.hbm %s649_s0, %s275_s4  ;;  %s125_s8 = scalar_lea.vmem [#allocation2], %s274_s3 }
  0x25   : > { %s132_s14 = sshll.u32 %s125_s8, 4  ;;  %p581_p11 = pnand %p305_p0, %p35_p3  ;;  %s133_s14 = int_to_ptr.vmem [resolvable:$true] %s132_s14 }
  0x26   : > { %s122_s19 = scalar_lea.sflag [#allocation3], %s121_s30  ;;  %s367_s21 = scalar_lea.hbm %s579_s7, 128 }
  0x27   : > { %p368_p12 = scmp.ne.s32.totalorder %s579_s7, %s367_s21  ;;  %p369_p13 = pneg %p581_p11 }
  0x28   : > { %s372_s24 = scalar_lea.hbm %s649_s0, 256  ;;  %p373_p10 = scmp.lt.s32.totalorder %s579_s7, %s649_s0 }
  0x29   : > { %p370_p5 = pnand %p369_p13, %p368_p12  ;;  %p374_p1 = scmp.lt.s32.totalorder %s372_s24, %s367_s21 }
  0x2b   : > { %p371_p7 = pneg %p370_p5  ;;  %p375_p2 = por %p374_p1, %p373_p10 }
  0x2d   : > { %p376_p0 = pnand %p375_p2, %p371_p7 }
  0x2f   : > { %379 = shalt.err (!%p376_p0)
}
  0x30   : > { %s380_s27 = scalar_lea.vmem %s133_s14, 128  ;;  %s466_s30 = smov [#allocation2]  }
  0x31   : > { %p381_p3 = scmp.ne.s32.totalorder %s133_s14, %s380_s27  ;;  %s385_s3 = sshll.u32 %s466_s30, 4  ;;  %s386_s3 = int_to_ptr.vmem [resolvable:$false] %s385_s3 }
  0x32   : > { %s387_s4 = scalar_lea.vmem %s386_s3, 256  ;;  %p388_p12 = scmp.lt.s32.totalorder %s133_s14, %s386_s3 }
  0x33   : > { %p383_p6 = pnand %p381_p3, %p369_p13  ;;  %p389_p5 = scmp.lt.s32.totalorder %s387_s4, %s380_s27 }
  0x35   : > { %p384_p9 = pneg %p383_p6  ;;  %p390_p4 = por %p389_p5, %p388_p12 }
  0x37   : > { %p391_p8 = pnand %p390_p4, %p384_p9 }
  0x39   : > { %394 = shalt.err (!%p391_p8)
}
  0x3a   : > { %299 = dma.hbm_to_vmem [thread:$0]  (!%p581_p11), %s579_s7, 128, %s133_s14, %s122_s19  }
  0x3b   : > { %p664_p7 = scmp.ne.s32.totalorder %s658_s17, 0 }
  0x3c   : > { %s602_s5 = sand.u32 (!%p664_p7), 1, %s455_s10   ;;  %p665_p6 = scmp.ne.s32.totalorder (!%p664_p7), %s656_s15, 0 }
  0x3d   : > { %141 = sbr.rel (%p664_p7) target bundleno = 95 (0x5f), region = 28  ;;  %s277_s6 = sshll.u32 (!%p664_p7), %s602_s5, 3 }
  0x3e   : > { %s144_s8 = scalar_lea.sflag (!%p664_p7), [#allocation3], %s602_s5  ;;  %s147_s21 = scalar_lea.vmem (!%p664_p7), [#allocation2], %s277_s6 }
  0x42   : > { %438 = dma.done.wait (%p665_p6), %s144_s8, 128  }
  0x43   : > { %440 = vsyncadd (%p665_p6), %s144_s8, 4294967168  ;;  %p666_p4 = scmp.eq.s32.totalorder %s504_s13, 0 }
  0x45   : > { %442 = dma.done.wait (%p666_p4), [#allocation6], 128   ;;  %p667_p8 = pmov %p666_p4 }
  0x46   : > { %s171_s17 = scalar_lea.vmem [#allocation7], %s277_s6  ;;  %s281_s14 = sshll.u32 %s504_s13, 7  ;;  %v172_v0 = vld [vmem:[%s147_s21] sm:$0xff]  ;;  %v173_v1 = vld [vmem:[#allocation5] sm:$0xff] }
  0x47   : > { %444 = vsyncadd (%p667_p8), [#allocation6], 4294967168  ;;  %s190_s7 = sshll.u32 %s171_s17, 4  ;;  %v174_v2 = vadd.f32 %v173_v1, %v172_v0  ;;  %s188_s15 = scalar_lea.hbm %s651_s2, %s281_s14  ;;  %s191_s7 = int_to_ptr.vmem [resolvable:$true] %s190_s7 }
  0x48   : > { %s177_s22 = scalar_lea.sflag [#allocation4], %s602_s5  ;;  %s395_s23 = scalar_lea.vmem %s191_s7, 128 }
  0x49   : > { %175 = vst [vmem:[%s171_s17] sm:$0xff] %v174_v2  ;;  %p396_p9 = scmp.ne.s32.totalorder %s191_s7, %s395_s23  ;;  %p668_p11 = scmp.ne.s32.totalorder %s662_s29, 0 }
  0x4a   : > { %s467_s24 = smov [#allocation7]  }
  0x4b   : > { %p397_p13 = pnand %p396_p9, %p668_p11  ;;  %s399_s25 = sshll.u32 %s467_s24, 4  ;;  %s400_s25 = int_to_ptr.vmem [resolvable:$false] %s399_s25 }
  0x4c   : > { %s401_s26 = scalar_lea.vmem %s400_s25, 256  ;;  %p402_p1 = scmp.lt.s32.totalorder %s191_s7, %s400_s25 }
  0x4d   : > { %p398_p10 = pneg %p397_p13  ;;  %p403_p2 = scmp.lt.s32.totalorder %s401_s26, %s395_s23 }
  0x4f   : > { %p404_p0 = por %p403_p2, %p402_p1 }
  0x51   : > { %p405_p3 = pnand %p404_p0, %p398_p10 }
  0x53   : > { %408 = shalt.err (!%p405_p3)
}
  0x54   : > { %s409_s13 = scalar_lea.hbm %s188_s15, 128  ;;  %s413_s3 = scalar_lea.hbm %s651_s2, 256 }
  0x55   : > { %p410_p12 = scmp.ne.s32.totalorder %s188_s15, %s409_s13  ;;  %p414_p6 = scmp.lt.s32.totalorder %s188_s15, %s651_s2 }
  0x56   : > { %p415_p4 = scmp.lt.s32.totalorder %s413_s3, %s409_s13 }
  0x57   : > { %p411_p5 = pnand %p410_p12, %p668_p11 }
  0x58   : > { %p416_p8 = por %p415_p4, %p414_p6 }
  0x59   : > { %p412_p7 = pneg %p411_p5 }
  0x5b   : > { %p417_p9 = pnand %p416_p8, %p412_p7 }
  0x5d   : > { %420 = shalt.err (!%p417_p9)
}
  0x5e   : > { %290 = dma.vmem_to_hbm [thread:$0]  (%p668_p11), %s191_s7, 128, %s188_s15, %s177_s22  }
  0x5f PF: > { %s202_s6 = sand.u32 1, %s451_s9   ;;  %p669_p13 = scmp.ne.s32.totalorder %s657_s16, 0 }
  0x60   : > { %p670_p10 = scmp.ge.s32.totalorder %s463_s12, 2  ;;  %s203_s8 = scalar_lea.sflag [#allocation4], %s202_s6 }
  0x62   : > { %p301_p1 = pnand %p670_p10, %p669_p13 }
  0x64   : > { %p302_p2 = pneg %p301_p1 }
  0x66   : > { %446 = dma.done.wait (%p302_p2), %s203_s8, 128  }
  0x67   : > { %448 = vsyncadd (%p302_p2), %s203_s8, 4294967168  ;;  %p16_p0 = scmp.ge.s32.totalorder %s531_s20, 4   ;;  %s671_s9 = smov %s455_s10 }
  0x68   : > { %s672_s10 = smov %s459_s11  ;;  %s673_s11 = smov %s558_s28 }
  0x69   : > { %s674_s12 = smov %s531_s20  ;;  %18 = sbr.rel (!%p16_p0) target bundleno = 6 (0x6), region = 77 }
  0x6e   :  { %208 = vsyncpa [#allocation3], 1 }
  0x6f   :  { %210 = vsyncpa [#allocation3 + $0x1], 1 }
  0x70   :  { %211 = vsyncpa [#allocation6], 1 }
  0x71   :  { %212 = vsyncpa [#allocation4], 1 }
  0x72   :  { %214 = vsyncpa [#allocation4 + $0x1], 1 }

// kernel: fpn_topdown_forward.5
= control target key start
LH: loop header
LB: loop body
LE: loop exit
PB: predicated region body
PF: predicated region fallthrough
CT: control target
= control target key end

     0   :  { %s782_s12 = smov 0   ;;  %s853_s0 = inlined_call_operand.vmem [shape: bf16[512,128], index: 0, kind: input, shape index: {}]   ;;  %s854_s1 = inlined_call_operand.vmem [shape: bf16[128,128], index: 1, kind: input, shape index: {}]   ;;  %s855_s2 = inlined_call_operand.vmem [shape: f32[1,128], index: 2, kind: input, shape index: {}]   ;;  %s856_s3 = inlined_call_operand.vmem [shape: bf16[512,128], index: 3, kind: output, shape index: {}]  }
   0x1 LB: > { %s559_s13 = sadd.s32 4294967295, %s760_s12   ;;  %p563_p0 = scmp.ge.s32.totalorder %s760_s12, 1  ;;  %s760_s12 = sphi %s782_s12, %s13_s12  }
   0x2   : > { %p138_p1 = scmp.lt.s32.totalorder %s760_s12, 5 }
   0x4   : > { %p139_p2 = pnand %p563_p0, %p138_p1 }
   0x5   : > { %s564_s16 = sshll.u32 (!%p139_p2), %s559_s13, 4 }
   0x6   : > { %142 = sbr.rel (%p139_p2) target bundleno = 258 (0x102), region = 32  ;;  %p163_p3 = scmp.lt.s32.totalorder (!%p139_p2), %s564_s16, 63 }
   0xb   : > { %v738_v0 = vld [vmem:[%s854_s1 + $0x38] sm:$0xff]   ;;  %v739_v1 = vld [vmem:[%s854_s1 + $0x30] sm:$0xff]   ;;  %s858_s16 = smov (!%p163_p3, %s564_s16), 63  ;;  %v740_v2 = vld [vmem:[%s854_s1 + $0x28] sm:$0xff]  }
   0xc   : > { %682 = vmatprep.subr.bf16.mxu0 %v738_v0  ;;  %714 = vmatprep.subr.bf16.mxu1 %v738_v0  ;;  %s565_s21 = sshll.u32 %s858_s16, 2  ;;  %v741_v3 = vld [vmem:[%s854_s1 + $0x20] sm:$0xff]   ;;  %v742_v6 = vld [vmem:[%s854_s1 + $0x18] sm:$0xff]   ;;  %v743_v7 = vld [vmem:[%s854_s1 + $0x10] sm:$0xff]  }
   0xd   : > { %683 = vmatpush3.bf16.msra.mxu0 %v738_v0  ;;  %722 = vmatpush3.bf16.msra.mxu1 %v738_v0  ;;  %s807_s24 = scalar_lea.vmem %s853_s0, %s565_s21  ;;  %v744_v8 = vld [vmem:[%s854_s1 + $0x8] sm:$0xff]   ;;  %v745_v9 = vld [vmem:[%s854_s1] sm:$0xff]   ;;  %s840_s13 = scalar_lea.vmem %s856_s3, %s565_s21 }
   0xe   : > { %684 = vmatprep.subr.bf16.mxu0 %v739_v1  ;;  %715 = vmatprep.subr.bf16.mxu1 %v739_v1  ;;  %v746_v4 = vld [vmem:[%s807_s24] sm:$0xff]   ;;  %v748_v10 = vld [vmem:[%s807_s24 + $0x8] sm:$0xff]   ;;  %v750_v12 = vld [vmem:[%s807_s24 + $0x10] sm:$0xff]  }
   0xf   : > { %v747_v5 = vld [vmem:[%s807_s24 + $0x20] sm:$0xff]   ;;  %698 = vmatprep.mubr.bf16.mxu0 %v746_v4  ;;  %v749_v11 = vld [vmem:[%s807_s24 + $0x28] sm:$0xff]   ;;  %v751_v13 = vld [vmem:[%s807_s24 + $0x30] sm:$0xff]  }
  0x10   : > { %706 = vmatprep.mubr.bf16.mxu1 %v747_v5  ;;  %v752_v14 = vld [vmem:[%s807_s24 + $0x18] sm:$0xff]   ;;  %v568_v16 = vld [vmem:[%s855_s2] ss:$0 sm:$0xff] }
  0x11   : > { %685 = vmatpush3.bf16.msra.mxu0 %v739_v1  ;;  %723 = vmatpush3.bf16.msra.mxu1 %v739_v1  ;;  %v753_v15 = vld [vmem:[%s807_s24 + $0x38] sm:$0xff]  }
  0x12   : > { %686 = vmatprep.subr.bf16.mxu0 %v740_v2  ;;  %716 = vmatprep.subr.bf16.mxu1 %v740_v2 }
  0x15   : > { %687 = vmatpush3.bf16.msra.mxu0 %v740_v2  ;;  %724 = vmatpush3.bf16.msra.mxu1 %v740_v2 }
  0x16   : > { %688 = vmatprep.subr.bf16.mxu0 %v741_v3  ;;  %717 = vmatprep.subr.bf16.mxu1 %v741_v3 }
  0x19   : > { %689 = vmatpush3.bf16.msra.mxu0 %v741_v3  ;;  %725 = vmatpush3.bf16.msra.mxu1 %v741_v3 }
  0x1a   : > { %690 = vmatprep.subr.bf16.mxu0 %v742_v6  ;;  %718 = vmatprep.subr.bf16.mxu1 %v742_v6 }
  0x1d   : > { %691 = vmatpush3.bf16.msra.mxu0 %v742_v6  ;;  %726 = vmatpush3.bf16.msra.mxu1 %v742_v6 }
  0x1e   : > { %692 = vmatprep.subr.bf16.mxu0 %v743_v7  ;;  %719 = vmatprep.subr.bf16.mxu1 %v743_v7 }
  0x21   : > { %693 = vmatpush3.bf16.msra.mxu0 %v743_v7  ;;  %727 = vmatpush3.bf16.msra.mxu1 %v743_v7 }
  0x22   : > { %694 = vmatprep.subr.bf16.mxu0 %v744_v8  ;;  %720 = vmatprep.subr.bf16.mxu1 %v744_v8 }
  0x25   : > { %695 = vmatpush3.bf16.msra.mxu0 %v744_v8  ;;  %728 = vmatpush3.bf16.msra.mxu1 %v744_v8 }
  0x26   : > { %696 = vmatprep.subr.bf16.mxu0 %v745_v9  ;;  %721 = vmatprep.subr.bf16.mxu1 %v745_v9 }
  0x29   : > { %697 = vmatpush3.bf16.msra.mxu0 %v745_v9  ;;  %729 = vmatpush3.bf16.msra.mxu1 %v745_v9 }
  0x2c   : > { %699 = vmatmul.mubr.bf16.vlgmr.msra.gmra.mxu0 %v748_v10  ;;  %707 = vmatmul.mubr.bf16.vlgmr.msra.gmra.mxu1 %v749_v11 }
  0x2d   : > { %702 = vmatprep.mubr.bf16.mxu0 %v750_v12  ;;  %710 = vmatprep.mubr.bf16.mxu1 %v751_v13 }
  0x34   : > { %703 = vmatmul.mubr.bf16.gmra.mxu0 %v752_v14  ;;  %711 = vmatmul.mubr.bf16.gmra.mxu1 %v753_v15 }
  0xec   : > { %v700_v17 = vpop.f32.mrf.mxu0  ;;  %v708_v18 = vpop.f32.mrf.mxu1 }
  0xed   : > { %v353_v19 = vadd.f32 %v700_v17, %v568_v16  ;;  %v385_v20 = vadd.f32 %v708_v18, %v568_v16 }
  0xee   : > { %v344_v21 = vpop.f32.mrf.mxu0  ;;  %v376_v22 = vpop.f32.mrf.mxu1 }
  0xef   : > { %v345_v23 = vadd.f32 %v568_v16, %v344_v21  ;;  %v377_v24 = vadd.f32 %v568_v16, %v376_v22  ;;  %v409_v29 = vmax.f32 %v353_v19, 0.0  ;;  %v417_v30 = vmax.f32 %v385_v20, 0.0 }
  0xf0   : > { %v701_v25 = vpop.f32.mrf.mxu0  ;;  %v709_v26 = vpop.f32.mrf.mxu1 }
  0xf1   : > { %v356_v27 = vadd.f32 %v701_v25, %v568_v16  ;;  %v388_v28 = vadd.f32 %v709_v26, %v568_v16  ;;  %v407_v37 = vmax.f32 %v345_v23, 0.0  ;;  %v415_v38 = vmax.f32 %v377_v24, 0.0 }
  0xf2   : > { %v347_v31 = vpop.f32.mrf.mxu0  ;;  %v379_v32 = vpop.f32.mrf.mxu1 }
  0xf3   : > { %v410_v33 = vmax.f32 %v356_v27, 0.0  ;;  %v418_v34 = vmax.f32 %v388_v28, 0.0  ;;  %v348_v35 = vadd.f32 %v568_v16, %v347_v31  ;;  %v380_v36 = vadd.f32 %v568_v16, %v379_v32 }
  0xf4   : > { %v704_v39 = vpop.f32.mrf.mxu0  ;;  %v712_v40 = vpop.f32.mrf.mxu1 }
  0xf5   : > { %v627_v41 = vpack.c.bf16 %v410_v33, %v409_v29  ;;  %v647_v42 = vpack.c.bf16 %v418_v34, %v417_v30  ;;  %v408_v43 = vmax.f32 %v348_v35, 0.0  ;;  %v416_v44 = vmax.f32 %v380_v36, 0.0 }
  0xf6   : > { %v369_v45 = vadd.f32 %v704_v39, %v568_v16  ;;  %v401_v46 = vadd.f32 %v712_v40, %v568_v16  ;;  %v360_v47 = vpop.f32.mrf.mxu0  ;;  %v392_v48 = vpop.f32.mrf.mxu1 }
  0xf7   : > { %659 = vst [vmem:[%s840_s13 + $0x8] sm:$0xff] %v627_v41   ;;  %663 = vst [vmem:[%s840_s13 + $0x28] sm:$0xff] %v647_v42   ;;  %v622_v49 = vpack.c.bf16 %v408_v43, %v407_v37  ;;  %v642_v50 = vpack.c.bf16 %v416_v44, %v415_v38  ;;  %v361_v51 = vadd.f32 %v568_v16, %v360_v47 }
  0xf8   : > { %v393_v52 = vadd.f32 %v568_v16, %v392_v48  ;;  %v705_v53 = vpop.f32.mrf.mxu0  ;;  %v713_v54 = vpop.f32.mrf.mxu1  ;;  %v413_v57 = vmax.f32 %v369_v45, 0.0  ;;  %v421_v58 = vmax.f32 %v401_v46, 0.0 }
  0xf9   : > { %623 = vst [vmem:[%s840_s13] sm:$0xff] %v622_v49   ;;  %662 = vst [vmem:[%s840_s13 + $0x20] sm:$0xff] %v642_v50   ;;  %v372_v55 = vadd.f32 %v705_v53, %v568_v16  ;;  %v404_v56 = vadd.f32 %v713_v54, %v568_v16  ;;  %v411_v1 = vmax.f32 %v361_v51, 0.0 }
  0xfa   : > { %v363_v59 = vpop.f32.mrf.mxu0  ;;  %v395_v60 = vpop.f32.mrf.mxu1  ;;  %v419_v2 = vmax.f32 %v393_v52, 0.0 }
  0xfb   : > { %v414_v61 = vmax.f32 %v372_v55, 0.0  ;;  %v422_v62 = vmax.f32 %v404_v56, 0.0  ;;  %v364_v63 = vadd.f32 %v568_v16, %v363_v59  ;;  %v396_v0 = vadd.f32 %v568_v16, %v395_v60 }
  0xfd   : > { %v637_v3 = vpack.c.bf16 %v414_v61, %v413_v57  ;;  %v657_v4 = vpack.c.bf16 %v422_v62, %v421_v58  ;;  %v412_v5 = vmax.f32 %v364_v63, 0.0  ;;  %v420_v6 = vmax.f32 %v396_v0, 0.0 }
  0xff   : > { %661 = vst [vmem:[%s840_s13 + $0x18] sm:$0xff] %v637_v3   ;;  %665 = vst [vmem:[%s840_s13 + $0x38] sm:$0xff] %v657_v4   ;;  %v632_v7 = vpack.c.bf16 %v412_v5, %v411_v1  ;;  %v652_v8 = vpack.c.bf16 %v420_v6, %v419_v2 }
 0x101   : > { %660 = vst [vmem:[%s840_s13 + $0x10] sm:$0xff] %v632_v7   ;;  %664 = vst [vmem:[%s840_s13 + $0x30] sm:$0xff] %v652_v8  }
 0x102 PF: > { %s13_s12 = sadd.s32 1, %s760_s12  }
 0x103   : > { %p10_p4 = scmp.ge.s32.totalorder %s13_s12, 6  }
 0x105   :  { %12 = sbr.rel (!%p10_p4) target bundleno = 1 (0x1), region = 62 }

// kernel: fpn_topdown_forward.7
= control target key start
LH: loop header
LB: loop body
LE: loop exit
PB: predicated region body
PF: predicated region fallthrough
CT: control target
= control target key end

     0   :  { %s782_s12 = smov 0   ;;  %s853_s0 = inlined_call_operand.vmem [shape: bf16[512,128], index: 0, kind: input, shape index: {}]   ;;  %s854_s1 = inlined_call_operand.vmem [shape: bf16[128,128], index: 1, kind: input, shape index: {}]   ;;  %s855_s2 = inlined_call_operand.vmem [shape: f32[1,128], index: 2, kind: input, shape index: {}]   ;;  %s856_s3 = inlined_call_operand.vmem [shape: bf16[512,128], index: 3, kind: output, shape index: {}]  }
   0x1 LB: > { %s559_s13 = sadd.s32 4294967295, %s760_s12   ;;  %p563_p0 = scmp.ge.s32.totalorder %s760_s12, 1  ;;  %s760_s12 = sphi %s782_s12, %s13_s12  }
   0x2   : > { %p138_p1 = scmp.lt.s32.totalorder %s760_s12, 5 }
   0x4   : > { %p139_p2 = pnand %p563_p0, %p138_p1 }
   0x5   : > { %s564_s16 = sshll.u32 (!%p139_p2), %s559_s13, 4 }
   0x6   : > { %142 = sbr.rel (%p139_p2) target bundleno = 258 (0x102), region = 32  ;;  %p163_p3 = scmp.lt.s32.totalorder (!%p139_p2), %s564_s16, 63 }
   0xb   : > { %v738_v0 = vld [vmem:[%s854_s1 + $0x38] sm:$0xff]   ;;  %v739_v1 = vld [vmem:[%s854_s1 + $0x30] sm:$0xff]   ;;  %s858_s16 = smov (!%p163_p3, %s564_s16), 63  ;;  %v740_v2 = vld [vmem:[%s854_s1 + $0x28] sm:$0xff]  }
   0xc   : > { %682 = vmatprep.subr.bf16.mxu0 %v738_v0  ;;  %714 = vmatprep.subr.bf16.mxu1 %v738_v0  ;;  %s565_s21 = sshll.u32 %s858_s16, 2  ;;  %v741_v3 = vld [vmem:[%s854_s1 + $0x20] sm:$0xff]   ;;  %v742_v6 = vld [vmem:[%s854_s1 + $0x18] sm:$0xff]   ;;  %v743_v7 = vld [vmem:[%s854_s1 + $0x10] sm:$0xff]  }
   0xd   : > { %683 = vmatpush3.bf16.msra.mxu0 %v738_v0  ;;  %722 = vmatpush3.bf16.msra.mxu1 %v738_v0  ;;  %s807_s24 = scalar_lea.vmem %s853_s0, %s565_s21  ;;  %v744_v8 = vld [vmem:[%s854_s1 + $0x8] sm:$0xff]   ;;  %v745_v9 = vld [vmem:[%s854_s1] sm:$0xff]   ;;  %s840_s13 = scalar_lea.vmem %s856_s3, %s565_s21 }
   0xe   : > { %684 = vmatprep.subr.bf16.mxu0 %v739_v1  ;;  %715 = vmatprep.subr.bf16.mxu1 %v739_v1  ;;  %v746_v4 = vld [vmem:[%s807_s24] sm:$0xff]   ;;  %v748_v10 = vld [vmem:[%s807_s24 + $0x8] sm:$0xff]   ;;  %v750_v12 = vld [vmem:[%s807_s24 + $0x10] sm:$0xff]  }
   0xf   : > { %v747_v5 = vld [vmem:[%s807_s24 + $0x20] sm:$0xff]   ;;  %698 = vmatprep.mubr.bf16.mxu0 %v746_v4  ;;  %v749_v11 = vld [vmem:[%s807_s24 + $0x28] sm:$0xff]   ;;  %v751_v13 = vld [vmem:[%s807_s24 + $0x30] sm:$0xff]  }
  0x10   : > { %706 = vmatprep.mubr.bf16.mxu1 %v747_v5  ;;  %v752_v14 = vld [vmem:[%s807_s24 + $0x18] sm:$0xff]   ;;  %v568_v16 = vld [vmem:[%s855_s2] ss:$0 sm:$0xff] }
  0x11   : > { %685 = vmatpush3.bf16.msra.mxu0 %v739_v1  ;;  %723 = vmatpush3.bf16.msra.mxu1 %v739_v1  ;;  %v753_v15 = vld [vmem:[%s807_s24 + $0x38] sm:$0xff]  }
  0x12   : > { %686 = vmatprep.subr.bf16.mxu0 %v740_v2  ;;  %716 = vmatprep.subr.bf16.mxu1 %v740_v2 }
  0x15   : > { %687 = vmatpush3.bf16.msra.mxu0 %v740_v2  ;;  %724 = vmatpush3.bf16.msra.mxu1 %v740_v2 }
  0x16   : > { %688 = vmatprep.subr.bf16.mxu0 %v741_v3  ;;  %717 = vmatprep.subr.bf16.mxu1 %v741_v3 }
  0x19   : > { %689 = vmatpush3.bf16.msra.mxu0 %v741_v3  ;;  %725 = vmatpush3.bf16.msra.mxu1 %v741_v3 }
  0x1a   : > { %690 = vmatprep.subr.bf16.mxu0 %v742_v6  ;;  %718 = vmatprep.subr.bf16.mxu1 %v742_v6 }
  0x1d   : > { %691 = vmatpush3.bf16.msra.mxu0 %v742_v6  ;;  %726 = vmatpush3.bf16.msra.mxu1 %v742_v6 }
  0x1e   : > { %692 = vmatprep.subr.bf16.mxu0 %v743_v7  ;;  %719 = vmatprep.subr.bf16.mxu1 %v743_v7 }
  0x21   : > { %693 = vmatpush3.bf16.msra.mxu0 %v743_v7  ;;  %727 = vmatpush3.bf16.msra.mxu1 %v743_v7 }
  0x22   : > { %694 = vmatprep.subr.bf16.mxu0 %v744_v8  ;;  %720 = vmatprep.subr.bf16.mxu1 %v744_v8 }
  0x25   : > { %695 = vmatpush3.bf16.msra.mxu0 %v744_v8  ;;  %728 = vmatpush3.bf16.msra.mxu1 %v744_v8 }
  0x26   : > { %696 = vmatprep.subr.bf16.mxu0 %v745_v9  ;;  %721 = vmatprep.subr.bf16.mxu1 %v745_v9 }
  0x29   : > { %697 = vmatpush3.bf16.msra.mxu0 %v745_v9  ;;  %729 = vmatpush3.bf16.msra.mxu1 %v745_v9 }
  0x2c   : > { %699 = vmatmul.mubr.bf16.vlgmr.msra.gmra.mxu0 %v748_v10  ;;  %707 = vmatmul.mubr.bf16.vlgmr.msra.gmra.mxu1 %v749_v11 }
  0x2d   : > { %702 = vmatprep.mubr.bf16.mxu0 %v750_v12  ;;  %710 = vmatprep.mubr.bf16.mxu1 %v751_v13 }
  0x34   : > { %703 = vmatmul.mubr.bf16.gmra.mxu0 %v752_v14  ;;  %711 = vmatmul.mubr.bf16.gmra.mxu1 %v753_v15 }
  0xec   : > { %v700_v17 = vpop.f32.mrf.mxu0  ;;  %v708_v18 = vpop.f32.mrf.mxu1 }
  0xed   : > { %v353_v19 = vadd.f32 %v700_v17, %v568_v16  ;;  %v385_v20 = vadd.f32 %v708_v18, %v568_v16 }
  0xee   : > { %v344_v21 = vpop.f32.mrf.mxu0  ;;  %v376_v22 = vpop.f32.mrf.mxu1 }
  0xef   : > { %v345_v23 = vadd.f32 %v568_v16, %v344_v21  ;;  %v377_v24 = vadd.f32 %v568_v16, %v376_v22  ;;  %v409_v29 = vmax.f32 %v353_v19, 0.0  ;;  %v417_v30 = vmax.f32 %v385_v20, 0.0 }
  0xf0   : > { %v701_v25 = vpop.f32.mrf.mxu0  ;;  %v709_v26 = vpop.f32.mrf.mxu1 }
  0xf1   : > { %v356_v27 = vadd.f32 %v701_v25, %v568_v16  ;;  %v388_v28 = vadd.f32 %v709_v26, %v568_v16  ;;  %v407_v37 = vmax.f32 %v345_v23, 0.0  ;;  %v415_v38 = vmax.f32 %v377_v24, 0.0 }
  0xf2   : > { %v347_v31 = vpop.f32.mrf.mxu0  ;;  %v379_v32 = vpop.f32.mrf.mxu1 }
  0xf3   : > { %v410_v33 = vmax.f32 %v356_v27, 0.0  ;;  %v418_v34 = vmax.f32 %v388_v28, 0.0  ;;  %v348_v35 = vadd.f32 %v568_v16, %v347_v31  ;;  %v380_v36 = vadd.f32 %v568_v16, %v379_v32 }
  0xf4   : > { %v704_v39 = vpop.f32.mrf.mxu0  ;;  %v712_v40 = vpop.f32.mrf.mxu1 }
  0xf5   : > { %v627_v41 = vpack.c.bf16 %v410_v33, %v409_v29  ;;  %v647_v42 = vpack.c.bf16 %v418_v34, %v417_v30  ;;  %v408_v43 = vmax.f32 %v348_v35, 0.0  ;;  %v416_v44 = vmax.f32 %v380_v36, 0.0 }
  0xf6   : > { %v369_v45 = vadd.f32 %v704_v39, %v568_v16  ;;  %v401_v46 = vadd.f32 %v712_v40, %v568_v16  ;;  %v360_v47 = vpop.f32.mrf.mxu0  ;;  %v392_v48 = vpop.f32.mrf.mxu1 }
  0xf7   : > { %659 = vst [vmem:[%s840_s13 + $0x8] sm:$0xff] %v627_v41   ;;  %663 = vst [vmem:[%s840_s13 + $0x28] sm:$0xff] %v647_v42   ;;  %v622_v49 = vpack.c.bf16 %v408_v43, %v407_v37  ;;  %v642_v50 = vpack.c.bf16 %v416_v44, %v415_v38  ;;  %v361_v51 = vadd.f32 %v568_v16, %v360_v47 }
  0xf8   : > { %v393_v52 = vadd.f32 %v568_v16, %v392_v48  ;;  %v705_v53 = vpop.f32.mrf.mxu0  ;;  %v713_v54 = vpop.f32.mrf.mxu1  ;;  %v413_v57 = vmax.f32 %v369_v45, 0.0  ;;  %v421_v58 = vmax.f32 %v401_v46, 0.0 }
  0xf9   : > { %623 = vst [vmem:[%s840_s13] sm:$0xff] %v622_v49   ;;  %662 = vst [vmem:[%s840_s13 + $0x20] sm:$0xff] %v642_v50   ;;  %v372_v55 = vadd.f32 %v705_v53, %v568_v16  ;;  %v404_v56 = vadd.f32 %v713_v54, %v568_v16  ;;  %v411_v1 = vmax.f32 %v361_v51, 0.0 }
  0xfa   : > { %v363_v59 = vpop.f32.mrf.mxu0  ;;  %v395_v60 = vpop.f32.mrf.mxu1  ;;  %v419_v2 = vmax.f32 %v393_v52, 0.0 }
  0xfb   : > { %v414_v61 = vmax.f32 %v372_v55, 0.0  ;;  %v422_v62 = vmax.f32 %v404_v56, 0.0  ;;  %v364_v63 = vadd.f32 %v568_v16, %v363_v59  ;;  %v396_v0 = vadd.f32 %v568_v16, %v395_v60 }
  0xfd   : > { %v637_v3 = vpack.c.bf16 %v414_v61, %v413_v57  ;;  %v657_v4 = vpack.c.bf16 %v422_v62, %v421_v58  ;;  %v412_v5 = vmax.f32 %v364_v63, 0.0  ;;  %v420_v6 = vmax.f32 %v396_v0, 0.0 }
  0xff   : > { %661 = vst [vmem:[%s840_s13 + $0x18] sm:$0xff] %v637_v3   ;;  %665 = vst [vmem:[%s840_s13 + $0x38] sm:$0xff] %v657_v4   ;;  %v632_v7 = vpack.c.bf16 %v412_v5, %v411_v1  ;;  %v652_v8 = vpack.c.bf16 %v420_v6, %v419_v2 }
 0x101   : > { %660 = vst [vmem:[%s840_s13 + $0x10] sm:$0xff] %v632_v7   ;;  %664 = vst [vmem:[%s840_s13 + $0x30] sm:$0xff] %v652_v8  }
 0x102 PF: > { %s13_s12 = sadd.s32 1, %s760_s12  }
 0x103   : > { %p10_p4 = scmp.ge.s32.totalorder %s13_s12, 6  }
 0x105   :  { %12 = sbr.rel (!%p10_p4) target bundleno = 1 (0x1), region = 62 }

// kernel: fpn_topdown_forward.6
= control target key start
LH: loop header
LB: loop body
LE: loop exit
PB: predicated region body
PF: predicated region fallthrough
CT: control target
= control target key end

     0   :  { %s3874_s12 = smov 0   ;;  %s4750_s0 = inlined_call_operand.vmem [shape: bf16[4,10,32,128], index: 0, kind: input, shape index: {}]   ;;  %s4751_s1 = inlined_call_operand.vmem [shape: bf16[9,128,128], index: 1, kind: input, shape index: {}]   ;;  %s4752_s2 = inlined_call_operand.vmem [shape: f32[1,128], index: 2, kind: input, shape index: {}]   ;;  %s4753_s3 = inlined_call_operand.vmem [shape: bf16[4,8,16,128], index: 3, kind: output, shape index: {}]  }
   0x1 LB: > { %s2761_s13 = sadd.s32 4294967295, %s3852_s12   ;;  %p2765_p0 = scmp.ge.s32.totalorder %s3852_s12, 1  ;;  %s3852_s12 = sphi %s3874_s12, %s13_s12  }
   0x2   : > { %p137_p1 = scmp.lt.s32.totalorder %s3852_s12, 5 }
   0x4   : > { %p138_p2 = pnand %p2765_p0, %p137_p1 }
   0x5   : > { %p161_p3 = scmp.lt.s32.totalorder (!%p138_p2), %s2761_s13, 3 }
   0x6   : > { %141 = sbr.rel (%p138_p2) target bundleno = 534 (0x216), region = 32 }
   0xb   : > { %v3746_v0 = vld [vmem:[%s4751_s1 + $0xf8] sm:$0xff]   ;;  %v3747_v1 = vld [vmem:[%s4751_s1 + $0xf0] sm:$0xff]   ;;  %s4755_s13 = smov (!%p161_p3, %s2761_s13), 3  ;;  %v3748_v2 = vld [vmem:[%s4751_s1 + $0xe8] sm:$0xff]   ;;  %vm977_vm0 = vsmask.f32 7424 }
   0xc   : > { %3289 = vmatprep.subr.bf16.mxu0 %v3746_v0  ;;  %3721 = vmatprep.subr.bf16.mxu1 %v3746_v0  ;;  %s3737_s20 = smul.u32 160, %s4755_s13  ;;  %v3749_v3 = vld [vmem:[%s4751_s1 + $0xe0] sm:$0xff]   ;;  %v3750_v6 = vld [vmem:[%s4751_s1 + $0xd8] sm:$0xff]   ;;  %v3751_v7 = vld [vmem:[%s4751_s1 + $0xd0] sm:$0xff]   ;;  %vm1844_vm1 = vcmask 1046528   ;;  %vm1163_vm2 = vcmask 1047552  }
   0xd   : > { %3290 = vmatpush3.bf16.msra.mxu0 %v3746_v0  ;;  %3729 = vmatpush3.bf16.msra.mxu1 %v3746_v0  ;;  %v3752_v8 = vld [vmem:[%s4751_s1 + $0xc8] sm:$0xff]   ;;  %v3753_v9 = vld [vmem:[%s4751_s1 + $0xc0] sm:$0xff]   ;;  %v3758_v10 = vld [vmem:[%s4751_s1 + $0x38] sm:$0xff]   ;;  %s3009_s18 = sshll.u32 %s4755_s13, 6 }
   0xe   : > { %3291 = vmatprep.subr.bf16.mxu0 %v3747_v1  ;;  %3722 = vmatprep.subr.bf16.mxu1 %v3747_v1  ;;  %s3897_s23 = scalar_lea.vmem %s4750_s0, %s3737_s20  ;;  %v3759_v12 = vld [vmem:[%s4751_s1 + $0x1b8] sm:$0xff]   ;;  %v3760_v14 = vld [vmem:[%s4751_s1 + $0x30] sm:$0xff]   ;;  %v3766_v18 = vld [vmem:[%s4751_s1 + $0x28] sm:$0xff]   ;;  %s4699_s21 = scalar_lea.vmem %s4753_s3, %s3009_s18 }
   0xf   : > { %v3903_v4 = vld [vmem:[%s3897_s23 + $0x10] sm:$0xff]   ;;  %v3926_v11 = vld [vmem:[%s3897_s23 + $0x18] sm:$0xff]   ;;  %v3941_v16 = vld [vmem:[%s3897_s23 + $0x20] sm:$0xff]  }
  0x10   : > { %v3906_v5 = vld [vmem:[%s3897_s23 + $0x50] sm:$0xff]   ;;  %3305 = vmatprep.mubr.bf16.mxu0 %v3903_v4  ;;  %v3932_v13 = vld [vmem:[%s3897_s23 + $0x58] sm:$0xff]   ;;  %v3944_v17 = vld [vmem:[%s3897_s23 + $0x60] sm:$0xff]   ;;  %v1002_v20 = vshll.u32 %v3926_v11, 16  ;;  %v1010_v23 = vshll.u32 %v3941_v16, 16  ;;  %v1006_v25 = vshrl.u32 %v3926_v11, 16 }
  0x11   : > { %3292 = vmatpush3.bf16.msra.mxu0 %v3747_v1  ;;  %3730 = vmatpush3.bf16.msra.mxu1 %v3747_v1  ;;  %v3761_v15 = vld [vmem:[%s4751_s1 + $0x1b0] sm:$0xff]   ;;  %v3767_v19 = vld [vmem:[%s4751_s1 + $0x1a8] sm:$0xff]   ;;  %v3768_v24 = vld [vmem:[%s4751_s1 + $0x20] sm:$0xff]   ;;  %v1014_v31 = vshrl.u32 %v3941_v16, 16 }
  0x12   : > { %3293 = vmatprep.subr.bf16.mxu0 %v3748_v2  ;;  %3723 = vmatprep.subr.bf16.mxu1 %v3748_v2  ;;  %v3958_v21 = vld [vmem:[%s3897_s23 + $0x28] sm:$0xff]   ;;  %v3769_v26 = vld [vmem:[%s4751_s1 + $0x1a0] sm:$0xff]   ;;  %v3972_v27 = vld [vmem:[%s3897_s23 + $0x30] sm:$0xff]   ;;  %v3974_v28 = vrot.slane %v1002_v20, 1  ;;  %v3986_v33 = vrot.slane %v1010_v23, 1 }
  0x13   : > { %3321 = vmatprep.mubr.bf16.mxu1 %v3906_v5  ;;  %v3961_v22 = vld [vmem:[%s3897_s23 + $0x68] sm:$0xff]   ;;  %v1018_v29 = vshll.u32 %v3958_v21, 16  ;;  %v3978_v30 = vld [vmem:[%s3897_s23 + $0x70] sm:$0xff]   ;;  %v3984_v32 = vld [vmem:[%s3897_s23 + $0x38] sm:$0xff]   ;;  %v1022_v35 = vshrl.u32 %v3958_v21, 16  ;;  %v1026_v41 = vshll.u32 %v3972_v27, 16 }
  0x14   : > { %v3774_v34 = vld [vmem:[%s4751_s1 + $0x18] sm:$0xff]   ;;  %v1034_v39 = vshll.u32 %v3984_v32, 16  ;;  %v3776_v40 = vld [vmem:[%s4751_s1 + $0x10] sm:$0xff]   ;;  %v1030_v43 = vshrl.u32 %v3972_v27, 16  ;;  %v4012_v44 = vld [vmem:[%s3897_s23 + $0x40] sm:$0xff]   ;;  %v1038_v45 = vshrl.u32 %v3984_v32, 16  ;;  %v1008_v62 = vor.u32 %v1006_v25, %v3974_v28 }
  0x15   : > { %3294 = vmatpush3.bf16.msra.mxu0 %v3748_v2  ;;  %3731 = vmatpush3.bf16.msra.mxu1 %v3748_v2  ;;  %v3775_v36 = vld [vmem:[%s4751_s1 + $0x198] sm:$0xff]   ;;  %v3995_v37 = vrot.slane %v1018_v29, 1  ;;  %v3777_v42 = vld [vmem:[%s4751_s1 + $0x190] sm:$0xff]   ;;  %v4016_v46 = vld [vmem:[%s3897_s23 + $0x80] sm:$0xff]   ;;  %v1042_v49 = vshll.u32 %v4012_v44, 16  ;;  %v1046_v51 = vshrl.u32 %v4012_v44, 16  ;;  %v1016_v63 = vor.u32 %v1014_v31, %v3986_v33 }
  0x16   : > { %3295 = vmatprep.subr.bf16.mxu0 %v3749_v3  ;;  %3724 = vmatprep.subr.bf16.mxu1 %v3749_v3  ;;  %v4000_v38 = vld [vmem:[%s3897_s23 + $0x78] sm:$0xff]   ;;  %v1036_v47 = vrot.slane %v1034_v39, 1  ;;  %v4021_v48 = vld [vmem:[%s3897_s23 + $0x48] sm:$0xff]   ;;  %v4038_v55 = vld [vmem:[%s3897_s23] sm:$0xf]  ;;  %v1028_v58 = vrot.slane %v1026_v41, 1 }
  0x17   : > { %v3782_v50 = vld [vmem:[%s4751_s1 + $0x8] sm:$0xff]   ;;  %v1050_v54 = vshll.u32 %v4021_v48, 16  ;;  %v173_v56 = vld [vmem:[%s3897_s23 + $0x4] sm:$0xf]  ;;  %v1044_v60 = vrot.slane %v1042_v49, 1  ;;  %v1024_v0 = vor.u32 %v1022_v35, %v3995_v37  ;;  %v3790_v20 = vld [vmem:[%s4751_s1 + $0x70] sm:$0xff]  }
  0x18   : > { %v4029_v52 = vld [vmem:[%s3897_s23 + $0x88] sm:$0xff]   ;;  %v3784_v57 = vld [vmem:[%s4751_s1] sm:$0xff]   ;;  %v4048_v61 = vcombine.low %v4038_v55, %v173_v56  ;;  %v1032_v1 = vor.u32 %v1030_v43, %v1028_v58  ;;  %v1040_v2 = vor.u32 %v1038_v45, %v1036_v47  ;;  %v3791_v23 = vld [vmem:[%s4751_s1 + $0x130] sm:$0xff]   ;;  %v1852_v39 = vrot.slane %v3941_v16, 1 }
  0x19   : > { %3296 = vmatpush3.bf16.msra.mxu0 %v3749_v3  ;;  %3732 = vmatpush3.bf16.msra.mxu1 %v3749_v3  ;;  %v3783_v53 = vld [vmem:[%s4751_s1 + $0x188] sm:$0xff]   ;;  %v3785_v59 = vld [vmem:[%s4751_s1 + $0x180] sm:$0xff]   ;;  %v1048_v3 = vor.u32 %v1046_v51, %v1044_v60  ;;  %v3797_v35 = vld [vmem:[%s4751_s1 + $0x118] sm:$0xff]   ;;  %v1854_v43 = vrot.slane %v3958_v21, 1  ;;  %v1856_v45 = vrot.slane %v3972_v27, 1  ;;  %v1858_v51 = vrot.slane %v3984_v32, 1 }
  0x1a   : > { %3297 = vmatprep.subr.bf16.mxu0 %v3750_v6  ;;  %3725 = vmatprep.subr.bf16.mxu1 %v3750_v6  ;;  %v3793_v25 = vld [vmem:[%s4751_s1 + $0x128] sm:$0xff]   ;;  %v3795_v29 = vld [vmem:[%s4751_s1 + $0x120] sm:$0xff]   ;;  %v1845_v31 = vrot.slane %v4048_v61, 1  ;;  %v3799_v41 = vld [vmem:[%s4751_s1 + $0x110] sm:$0xff]  }
  0x1b   : > { %v3800_v49 = vld [vmem:[%s4751_s1 + $0x48] sm:$0xff]   ;;  %vm1164_vm3 = vmand %vm1163_vm2, %vm977_vm0 }
  0x1d   : > { %3298 = vmatpush3.bf16.msra.mxu0 %v3750_v6  ;;  %3733 = vmatpush3.bf16.msra.mxu1 %v3750_v6  ;;  %v4057_v6 = vrot.slane %v1050_v54, 1  ;;  %v3805_v54 = vld [vmem:[%s4751_s1 + $0x100] sm:$0xff]  }
  0x1e   : > { %3299 = vmatprep.subr.bf16.mxu0 %v3751_v7  ;;  %3726 = vmatprep.subr.bf16.mxu1 %v3751_v7 }
  0x21   : > { %3300 = vmatpush3.bf16.msra.mxu0 %v3751_v7  ;;  %3734 = vmatpush3.bf16.msra.mxu1 %v3751_v7  ;;  %v3788_v7 = vld [vmem:[%s4751_s1 + $0x78] sm:$0xff]  }
  0x22   : > { %3301 = vmatprep.subr.bf16.mxu0 %v3752_v8  ;;  %3727 = vmatprep.subr.bf16.mxu1 %v3752_v8 }
  0x25   : > { %3302 = vmatpush3.bf16.msra.mxu0 %v3752_v8  ;;  %3735 = vmatpush3.bf16.msra.mxu1 %v3752_v8  ;;  %v3789_v8 = vld [vmem:[%s4751_s1 + $0x138] sm:$0xff]  }
  0x26   : > { %3303 = vmatprep.subr.bf16.mxu0 %v3753_v9  ;;  %3728 = vmatprep.subr.bf16.mxu1 %v3753_v9 }
  0x29   : > { %3304 = vmatpush3.bf16.msra.mxu0 %v3753_v9  ;;  %3736 = vmatpush3.bf16.msra.mxu1 %v3753_v9  ;;  %v4069_v9 = vsel %vm977_vm0, %v1008_v62, %v3986_v33  ;;  %v4202_v62 = vld [vmem:[%s3897_s23 + $0x90] sm:$0xff]  }
  0x2a   : > { %3337 = vmatprep.subr.bf16.mxu1 %v3758_v10  ;;  %3385 = vmatprep.subr.bf16.mxu0 %v3759_v12 }
  0x2c   : > { %3306 = vmatmul.mubr.bf16.vlgmr.msra.gmra.mxu0 %v3926_v11  ;;  %3322 = vmatmul.mubr.bf16.vlgmr.msra.gmra.mxu1 %v3932_v13 }
  0x2d   : > { %3338 = vmatpush3.bf16.msra.mxu1 %v3758_v10  ;;  %3386 = vmatpush3.bf16.msra.mxu0 %v3759_v12  ;;  %v4073_v10 = vsel %vm977_vm0, %v1016_v63, %v3995_v37  ;;  %v4076_v12 = vsel %vm977_vm0, %v1024_v0, %v1028_v58  ;;  %v1850_v37 = vrot.slane %v3926_v11, 1  ;;  %v3806_v58 = vld [vmem:[%s4751_s1 + $0x1f8] sm:$0xff]   ;;  %v998_v63 = vshrl.u32 %v3903_v4, 16 }
  0x2e   : > { %3339 = vmatprep.subr.bf16.mxu1 %v3760_v14  ;;  %3387 = vmatprep.subr.bf16.mxu0 %v3761_v15  ;;  %v979_v0 = vshrl.u32 %v4048_v61, 16 }
  0x2f   : > { %3309 = vmatprep.mubr.bf16.mxu0 %v3941_v16  ;;  %3325 = vmatprep.mubr.bf16.mxu1 %v3944_v17 }
  0x31   : > { %3340 = vmatpush3.bf16.msra.mxu1 %v3760_v14  ;;  %3388 = vmatpush3.bf16.msra.mxu0 %v3761_v15  ;;  %v4079_v14 = vld [vmem:[%s3897_s23 + $0x8] sm:$0xff]   ;;  %v4082_v15 = vsel %vm977_vm0, %v1032_v1, %v1036_v47  ;;  %v4149_v47 = vsel %vm1844_vm1, %v1854_v43, %v1856_v45 }
  0x32   : > { %3341 = vmatprep.subr.bf16.mxu1 %v3766_v18  ;;  %3389 = vmatprep.subr.bf16.mxu0 %v3767_v19  ;;  %v1846_v33 = vrot.slane %v4079_v14, 1 }
  0x34   : > { %3310 = vmatmul.mubr.bf16.gmra.mxu0 %v3958_v21  ;;  %3326 = vmatmul.mubr.bf16.gmra.mxu1 %v3961_v22 }
  0x35   : > { %3342 = vmatpush3.bf16.msra.mxu1 %v3766_v18  ;;  %3390 = vmatpush3.bf16.msra.mxu0 %v3767_v19  ;;  %v4085_v18 = vsel %vm977_vm0, %v1040_v2, %v1044_v60  ;;  %v4089_v19 = vsel %vm977_vm0, %v1048_v3, %v4057_v6  ;;  %v994_v60 = vshll.u32 %v3903_v4, 16  ;;  %v986_v2 = vshll.u32 %v4079_v14, 16 }
  0x36   : > { %3343 = vmatprep.subr.bf16.mxu1 %v3768_v24  ;;  %3391 = vmatprep.subr.bf16.mxu0 %v3769_v26 }
  0x37   : > { %3313 = vmatprep.mubr.bf16.mxu0 %v3972_v27  ;;  %3329 = vmatprep.mubr.bf16.mxu1 %v3978_v30  ;;  %v996_v3 = vrot.slane %v994_v60, 1 }
  0x39   : > { %3344 = vmatpush3.bf16.msra.mxu1 %v3768_v24  ;;  %3392 = vmatpush3.bf16.msra.mxu0 %v3769_v26  ;;  %v3792_v24 = vld [vmem:[%s4751_s1 + $0x68] sm:$0xff]   ;;  %v3794_v26 = vld [vmem:[%s4751_s1 + $0x60] sm:$0xff]  }
  0x3a   : > { %3345 = vmatprep.subr.bf16.mxu1 %v3774_v34  ;;  %3393 = vmatprep.subr.bf16.mxu0 %v3775_v36 }
  0x3c   : > { %3314 = vmatmul.mubr.bf16.gmra.mxu0 %v3984_v32  ;;  %3330 = vmatmul.mubr.bf16.gmra.mxu1 %v4000_v38 }
  0x3d   : > { %3346 = vmatpush3.bf16.msra.mxu1 %v3774_v34  ;;  %3394 = vmatpush3.bf16.msra.mxu0 %v3775_v36  ;;  %v3796_v34 = vld [vmem:[%s4751_s1 + $0x58] sm:$0xff]   ;;  %v4128_v36 = vsel %vm1844_vm1, %v1845_v31, %v1846_v33  ;;  %v3809_v31 = vld [vmem:[%s4751_s1 + $0xb0] sm:$0xff]  }
  0x3e   : > { %3347 = vmatprep.subr.bf16.mxu1 %v3776_v40  ;;  %3395 = vmatprep.subr.bf16.mxu0 %v3777_v42 }
  0x3f   : > { %3317 = vmatprep.mubr.bf16.mxu0 %v4012_v44  ;;  %3333 = vmatprep.mubr.bf16.mxu1 %v4016_v46 }
  0x41   : > { %3348 = vmatpush3.bf16.msra.mxu1 %v3776_v40  ;;  %3396 = vmatpush3.bf16.msra.mxu0 %v3777_v42  ;;  %v3798_v40 = vld [vmem:[%s4751_s1 + $0x50] sm:$0xff]   ;;  %v4141_v42 = vsel %vm1844_vm1, %v1850_v37, %v1852_v39 }
  0x42   : > { %3349 = vmatprep.subr.bf16.mxu1 %v3782_v50  ;;  %3397 = vmatprep.subr.bf16.mxu0 %v3783_v53 }
  0x44   : > { %3318 = vmatmul.mubr.bf16.gmra.mxu0 %v4021_v48  ;;  %3334 = vmatmul.mubr.bf16.gmra.mxu1 %v4029_v52 }
  0x45   : > { %3350 = vmatpush3.bf16.msra.mxu1 %v3782_v50  ;;  %3398 = vmatpush3.bf16.msra.mxu0 %v3783_v53  ;;  %v3801_v50 = vld [vmem:[%s4751_s1 + $0x108] sm:$0xff]   ;;  %v3804_v53 = vld [vmem:[%s4751_s1 + $0x40] sm:$0xff]  }
  0x46   : > { %3351 = vmatprep.subr.bf16.mxu1 %v3784_v57  ;;  %3399 = vmatprep.subr.bf16.mxu0 %v3785_v59 }
  0x47   : > { %3353 = vmatprep.mubr.bf16.mxu1 %v4048_v61  ;;  %3401 = vmatprep.mubr.bf16.mxu0 %v3941_v16 }
  0x49   : > { %3352 = vmatpush3.bf16.msra.mxu1 %v3784_v57  ;;  %3400 = vmatpush3.bf16.msra.mxu0 %v3785_v59  ;;  %v1862_v57 = vrot.slane %v4021_v48, 1  ;;  %v981_v59 = vshll.u32 %v4048_v61, 16 }
  0x4a   : > { %3433 = vmatprep.subr.bf16.mxu1 %v3788_v7  ;;  %3481 = vmatprep.subr.bf16.mxu0 %v3789_v8 }
  0x4b   : > { %v983_v1 = vrot.slane %v981_v59, 1  ;;  %v1074_v59 = vshll.u32 %v3944_v17, 16 }
  0x4c   : > { %3354 = vmatmul.mubr.bf16.vlgmr.msra.gmra.mxu1 %v4079_v14  ;;  %3402 = vmatmul.mubr.bf16.vlgmr.msra.gmra.mxu0 %v3958_v21 }
  0x4d   : > { %3434 = vmatpush3.bf16.msra.mxu1 %v3788_v7  ;;  %3482 = vmatpush3.bf16.msra.mxu0 %v3789_v8  ;;  %v984_v7 = vor.u32 %v983_v1, %v979_v0  ;;  %v988_v8 = vrot.slane %v986_v2, 1  ;;  %v1078_v0 = vshrl.u32 %v3944_v17, 16  ;;  %v1082_v1 = vshll.u32 %v3961_v22, 16  ;;  %v3820_v2 = vld [vmem:[%s4751_s1 + $0x1c0] sm:$0xff]  }
  0x4e   : > { %3357 = vmatprep.mubr.bf16.mxu1 %v3903_v4  ;;  %3405 = vmatprep.mubr.bf16.mxu0 %v3972_v27  ;;  %v990_v4 = vshrl.u32 %v4079_v14, 16  ;;  %v3827_v14 = vld [vmem:[%s4751_s1 + $0x228] sm:$0xff]  }
  0x4f   : > { %3435 = vmatprep.subr.bf16.mxu1 %v3790_v20  ;;  %3483 = vmatprep.subr.bf16.mxu0 %v3791_v23  ;;  %v989_v61 = vsel %vm977_vm0, %v984_v7, %v988_v8 }
  0x51   : > { %3436 = vmatpush3.bf16.msra.mxu1 %v3790_v20  ;;  %3484 = vmatpush3.bf16.msra.mxu0 %v3791_v23  ;;  %v1000_v20 = vor.u32 %v998_v63, %v996_v3  ;;  %v4212_v23 = vld [vmem:[%s3897_s23 + $0x98] sm:$0xff]  }
  0x52   : > { %3437 = vmatprep.subr.bf16.mxu1 %v3792_v24  ;;  %3485 = vmatprep.subr.bf16.mxu0 %v3793_v25 }
  0x54   : > { %3358 = vmatmul.mubr.bf16.gmra.mxu1 %v3926_v11  ;;  %3406 = vmatmul.mubr.bf16.gmra.mxu0 %v3984_v32  ;;  %v3826_v11 = vld [vmem:[%s4751_s1 + $0x168] sm:$0xff]  }
  0x55   : > { %3361 = vmatprep.mubr.bf16.mxu1 %v3941_v16  ;;  %3409 = vmatprep.mubr.bf16.mxu0 %v4012_v44  ;;  %v4146_v16 = vsel %vm1844_vm1, %v1852_v39, %v1854_v43  ;;  %v3813_v39 = vld [vmem:[%s4751_s1 + $0xa0] sm:$0xff]   ;;  %v1054_v43 = vshrl.u32 %v4021_v48, 16 }
  0x56   : > { %3438 = vmatpush3.bf16.msra.mxu1 %v3792_v24  ;;  %3486 = vmatpush3.bf16.msra.mxu0 %v3793_v25  ;;  %v1005_v24 = vsel %vm977_vm0, %v1000_v20, %v3974_v28  ;;  %v992_v25 = vor.u32 %v990_v4, %v988_v8  ;;  %v3810_v28 = vld [vmem:[%s4751_s1 + $0x1e8] sm:$0xff]   ;;  %v1084_v8 = vrot.slane %v1082_v1, 1  ;;  %v3822_v20 = vld [vmem:[%s4751_s1 + $0x178] sm:$0xff]  }
  0x57   : > { %3439 = vmatprep.subr.bf16.mxu1 %v3794_v26  ;;  %3487 = vmatprep.subr.bf16.mxu0 %v3795_v29  ;;  %v3823_v4 = vld [vmem:[%s4751_s1 + $0x238] sm:$0xff]  }
  0x5a   : > { %3440 = vmatpush3.bf16.msra.mxu1 %v3794_v26  ;;  %3488 = vmatpush3.bf16.msra.mxu0 %v3795_v29  ;;  %v997_v26 = vsel %vm977_vm0, %v992_v25, %v996_v3  ;;  %v3808_v29 = vld [vmem:[%s4751_s1 + $0x1f0] sm:$0xff]   ;;  %v3821_v3 = vld [vmem:[%s4751_s1 + $0x80] sm:$0xff]   ;;  %v1086_v25 = vshrl.u32 %v3961_v22, 16 }
  0x5b   : > { %3441 = vmatprep.subr.bf16.mxu1 %v3796_v34  ;;  %3489 = vmatprep.subr.bf16.mxu0 %v3797_v35 }
  0x5c   : > { %3362 = vmatmul.mubr.bf16.gmra.mxu1 %v3958_v21  ;;  %3410 = vmatmul.mubr.bf16.gmra.mxu0 %v4021_v48  ;;  %v4163_v21 = vsel %vm1844_vm1, %v1856_v45, %v1858_v51  ;;  %v1062_v45 = vshrl.u32 %v3906_v5, 16 }
  0x5d   : > { %3365 = vmatprep.mubr.bf16.mxu1 %v3972_v27  ;;  %3413 = vmatprep.mubr.bf16.mxu0 %v3906_v5  ;;  %v1860_v27 = vrot.slane %v4012_v44, 1 }
  0x5e   : > { %3442 = vmatpush3.bf16.msra.mxu1 %v3796_v34  ;;  %3490 = vmatpush3.bf16.msra.mxu0 %v3797_v35  ;;  %v3811_v34 = vld [vmem:[%s4751_s1 + $0xa8] sm:$0xff]   ;;  %v3812_v35 = vld [vmem:[%s4751_s1 + $0x1e0] sm:$0xff]  }
  0x5f   : > { %3443 = vmatprep.subr.bf16.mxu1 %v3798_v40  ;;  %3491 = vmatprep.subr.bf16.mxu0 %v3799_v41  ;;  %v4173_v56 = vsel %vm1844_vm1, %v1858_v51, %v1860_v27  ;;  %v3817_v51 = vld [vmem:[%s4751_s1 + $0x90] sm:$0xff]  }
  0x62   : > { %3444 = vmatpush3.bf16.msra.mxu1 %v3798_v40  ;;  %3492 = vmatpush3.bf16.msra.mxu0 %v3799_v41  ;;  %v3814_v40 = vld [vmem:[%s4751_s1 + $0x1d8] sm:$0xff]  }
  0x63   : > { %3445 = vmatprep.subr.bf16.mxu1 %v3800_v49  ;;  %3493 = vmatprep.subr.bf16.mxu0 %v3801_v50  ;;  %v3815_v41 = vld [vmem:[%s4751_s1 + $0x98] sm:$0xff]  }
  0x64   : > { %3366 = vmatmul.mubr.bf16.gmra.mxu1 %v3984_v32  ;;  %3414 = vmatmul.mubr.bf16.gmra.mxu0 %v3932_v13  ;;  %v3807_v32 = vld [vmem:[%s4751_s1 + $0xb8] sm:$0xff]  }
  0x65   : > { %3369 = vmatprep.mubr.bf16.mxu1 %v4012_v44  ;;  %3417 = vmatprep.mubr.bf16.mxu0 %v3944_v17  ;;  %v4189_v44 = vsel %vm1844_vm1, %v1860_v27, %v1862_v57 }
  0x66   : > { %3446 = vmatpush3.bf16.msra.mxu1 %v3800_v49  ;;  %3494 = vmatpush3.bf16.msra.mxu0 %v3801_v50  ;;  %v1066_v49 = vshll.u32 %v3932_v13, 16  ;;  %v3816_v50 = vld [vmem:[%s4751_s1 + $0x1d0] sm:$0xff]  }
  0x67   : > { %3447 = vmatprep.subr.bf16.mxu1 %v3804_v53  ;;  %3495 = vmatprep.subr.bf16.mxu0 %v3805_v54 }
  0x6a   : > { %3448 = vmatpush3.bf16.msra.mxu1 %v3804_v53  ;;  %3496 = vmatpush3.bf16.msra.mxu0 %v3805_v54  ;;  %v1068_v54 = vrot.slane %v1066_v49, 1 }
  0x6b   : > { %3529 = vmatprep.subr.bf16.mxu1 %v3806_v58  ;;  %3577 = vmatprep.subr.bf16.mxu0 %v3807_v32 }
  0x6c   : > { %3370 = vmatmul.mubr.bf16.gmra.mxu1 %v4021_v48  ;;  %3418 = vmatmul.mubr.bf16.gmra.mxu0 %v3961_v22 }
  0x6d   : > { %3373 = vmatprep.mubr.bf16.mxu1 %v3906_v5  ;;  %3421 = vmatprep.mubr.bf16.mxu0 %v3978_v30 }
  0x74   : > { %3374 = vmatmul.mubr.bf16.gmra.mxu1 %v3932_v13  ;;  %3422 = vmatmul.mubr.bf16.gmra.mxu0 %v4000_v38 }
  0x75   : > { %3377 = vmatprep.mubr.bf16.mxu1 %v3944_v17  ;;  %3425 = vmatprep.mubr.bf16.mxu0 %v4016_v46 }
  0x7c   : > { %3378 = vmatmul.mubr.bf16.gmra.mxu1 %v3961_v22  ;;  %3426 = vmatmul.mubr.bf16.gmra.mxu0 %v4029_v52  ;;  %v1088_v22 = vor.u32 %v1086_v25, %v1084_v8  ;;  %v3842_v25 = vld [vmem:[%s3897_s23 + $0x60] sm:$0xff]  }
  0x7d   : > { %3381 = vmatprep.mubr.bf16.mxu1 %v3978_v30  ;;  %3429 = vmatprep.mubr.bf16.mxu0 %v4202_v62  ;;  %v1868_v48 = vrot.slane %v3842_v25, 1 }
  0x84   : > { %3382 = vmatmul.mubr.bf16.gmra.mxu1 %v4000_v38  ;;  %3430 = vmatmul.mubr.bf16.gmra.mxu0 %v4212_v23 }
  0x85   : > { %3449 = vmatprep.mubr.bf16.mxu1 %v989_v61  ;;  %3497 = vmatprep.mubr.bf16.mxu0 %v1005_v24  ;;  %v1090_v61 = vshll.u32 %v3978_v30, 16 }
  0x8c   : > { %3450 = vmatmul.mubr.bf16.vlgmr.msra.gmra.mxu1 %v997_v26  ;;  %3498 = vmatmul.mubr.bf16.vlgmr.msra.gmra.mxu0 %v4069_v9 }
  0x8d   : > { %3530 = vmatpush3.bf16.msra.mxu1 %v3806_v58  ;;  %3578 = vmatpush3.bf16.msra.mxu0 %v3807_v32  ;;  %v3818_v58 = vld [vmem:[%s4751_s1 + $0x1c8] sm:$0xff]  }
  0x8e   : > { %3453 = vmatprep.mubr.bf16.mxu1 %v1005_v24  ;;  %3501 = vmatprep.mubr.bf16.mxu0 %v4073_v10  ;;  %v3819_v32 = vld [vmem:[%s4751_s1 + $0x88] sm:$0xff]  }
  0x8f   : > { %3531 = vmatprep.subr.bf16.mxu1 %v3808_v29  ;;  %3579 = vmatprep.subr.bf16.mxu0 %v3809_v31 }
  0x91   : > { %3532 = vmatpush3.bf16.msra.mxu1 %v3808_v29  ;;  %3580 = vmatpush3.bf16.msra.mxu0 %v3809_v31  ;;  %v1094_v29 = vshrl.u32 %v3978_v30, 16  ;;  %v1098_v31 = vshll.u32 %v4000_v38, 16  ;;  %v1106_v30 = vshll.u32 %v4016_v46, 16 }
  0x92   : > { %3533 = vmatprep.subr.bf16.mxu1 %v3810_v28  ;;  %3581 = vmatprep.subr.bf16.mxu0 %v3811_v34 }
  0x94   : > { %3454 = vmatmul.mubr.bf16.gmra.mxu1 %v4069_v9  ;;  %3502 = vmatmul.mubr.bf16.gmra.mxu0 %v4076_v12  ;;  %v1058_v9 = vshll.u32 %v3906_v5, 16  ;;  %v1056_v5 = vor.u32 %v1054_v43, %v4057_v6  ;;  %v1070_v6 = vshrl.u32 %v3932_v13, 16  ;;  %v1076_v13 = vrot.slane %v1074_v59, 1 }
  0x95   : > { %3457 = vmatprep.mubr.bf16.mxu1 %v4073_v10  ;;  %3505 = vmatprep.mubr.bf16.mxu0 %v4082_v15  ;;  %v1114_v43 = vshll.u32 %v4029_v52, 16 }
  0x96   : > { %3534 = vmatpush3.bf16.msra.mxu1 %v3810_v28  ;;  %3582 = vmatpush3.bf16.msra.mxu0 %v3811_v34  ;;  %v1060_v27 = vrot.slane %v1058_v9, 1  ;;  %v1072_v17 = vor.u32 %v1070_v6, %v1068_v54  ;;  %v1080_v7 = vor.u32 %v1078_v0, %v1076_v13  ;;  %v1092_v28 = vrot.slane %v1090_v61, 1 }
  0x97   : > { %3535 = vmatprep.subr.bf16.mxu1 %v3812_v35  ;;  %3583 = vmatprep.subr.bf16.mxu0 %v3813_v39  ;;  %v1110_v9 = vshrl.u32 %v4016_v46, 16 }
  0x98   : > { %v1064_v53 = vor.u32 %v1062_v45, %v1060_v27  ;;  %v4274_v60 = vsel %vm977_vm0, %v1056_v5, %v1060_v27  ;;  %v4300_v24 = vsel %vm977_vm0, %v1072_v17, %v1076_v13  ;;  %v4304_v26 = vsel %vm977_vm0, %v1080_v7, %v1084_v8  ;;  %v3840_v13 = vld [vmem:[%s3897_s23 + $0x50] sm:$0xff]   ;;  %v3841_v7 = vld [vmem:[%s3897_s23 + $0x58] sm:$0xff]  }
  0x99   : > { %v1096_v34 = vor.u32 %v1094_v29, %v1092_v28  ;;  %v1108_v45 = vrot.slane %v1106_v30, 1  ;;  %v1118_v5 = vshrl.u32 %v4029_v52, 16  ;;  %v3839_v52 = vld [vmem:[%s3897_s23 + $0x10] sm:$0xff]   ;;  %v1864_v17 = vrot.slane %v3840_v13, 1  ;;  %v3843_v29 = vld [vmem:[%s3897_s23 + $0x68] sm:$0xff]  }
  0x9a   : > { %3536 = vmatpush3.bf16.msra.mxu1 %v3812_v35  ;;  %3584 = vmatpush3.bf16.msra.mxu0 %v3813_v39  ;;  %v4278_v63 = vsel %vm977_vm0, %v1064_v53, %v1068_v54  ;;  %v1100_v35 = vrot.slane %v1098_v31, 1  ;;  %v4314_v39 = vsel %vm977_vm0, %v1088_v22, %v1092_v28  ;;  %v1122_v53 = vshll.u32 %v4202_v62, 16 }
  0x9b   : > { %3537 = vmatprep.subr.bf16.mxu1 %v3814_v40  ;;  %3585 = vmatprep.subr.bf16.mxu0 %v3815_v41  ;;  %v1848_v6 = vrot.slane %v3839_v52, 1  ;;  %v1866_v8 = vrot.slane %v3841_v7, 1  ;;  %v1870_v31 = vrot.slane %v3843_v29, 1 }
  0x9c   : > { %3458 = vmatmul.mubr.bf16.gmra.mxu1 %v4076_v12  ;;  %3506 = vmatmul.mubr.bf16.gmra.mxu0 %v4085_v18 }
  0x9d   : > { %3461 = vmatprep.mubr.bf16.mxu1 %v4082_v15  ;;  %3509 = vmatprep.mubr.bf16.mxu0 %v4089_v19  ;;  %v1849_v0 = vsel %vm1844_vm1, %v1846_v33, %v1848_v6  ;;  %v4355_v1 = vsel %vm1844_vm1, %v1848_v6, %v1850_v37  ;;  %v3830_v33 = vld [vmem:[%s4751_s1 + $0x158] sm:$0xff]   ;;  %v3834_v37 = vld [vmem:[%s4751_s1 + $0x148] sm:$0xff]  }
  0x9e   : > { %3538 = vmatpush3.bf16.msra.mxu1 %v3814_v40  ;;  %3586 = vmatpush3.bf16.msra.mxu0 %v3815_v41  ;;  %v1102_v40 = vshrl.u32 %v4000_v38, 16  ;;  %v4318_v41 = vsel %vm977_vm0, %v1096_v34, %v1100_v35  ;;  %v4435_v34 = vsel %vm1844_vm1, %v1866_v8, %v1868_v48 }
  0x9f   : > { %3539 = vmatprep.subr.bf16.mxu1 %v3816_v50  ;;  %3587 = vmatprep.subr.bf16.mxu0 %v3817_v51 }
  0xa0   : > { %v1104_v49 = vor.u32 %v1102_v40, %v1100_v35  ;;  %v1126_v40 = vshrl.u32 %v4202_v62, 16 }
  0xa2   : > { %3540 = vmatpush3.bf16.msra.mxu1 %v3816_v50  ;;  %3588 = vmatpush3.bf16.msra.mxu0 %v3817_v51  ;;  %v1112_v50 = vor.u32 %v1110_v9, %v1108_v45  ;;  %v1116_v51 = vrot.slane %v1114_v43, 1  ;;  %v4327_v27 = vsel %vm977_vm0, %v1104_v49, %v1108_v45  ;;  %v3844_v45 = vld [vmem:[%s3897_s23 + $0x70] sm:$0xff]  }
  0xa3   : > { %3541 = vmatprep.subr.bf16.mxu1 %v3818_v58  ;;  %3589 = vmatprep.subr.bf16.mxu0 %v3819_v32  ;;  %v1872_v49 = vrot.slane %v3844_v45, 1 }
  0xa4   : > { %3462 = vmatmul.mubr.bf16.gmra.mxu1 %v4085_v18  ;;  %3510 = vmatmul.mubr.bf16.gmra.mxu0 %v4274_v60  ;;  %v4332_v54 = vsel %vm977_vm0, %v1112_v50, %v1116_v51  ;;  %v4453_v50 = vcombine.low %v4038_v55, %v4038_v55 }
  0xa5   : > { %3465 = vmatprep.mubr.bf16.mxu1 %v4089_v19  ;;  %3513 = vmatprep.mubr.bf16.mxu0 %v4278_v63 }
  0xa6   : > { %3542 = vmatpush3.bf16.msra.mxu1 %v3818_v58  ;;  %3590 = vmatpush3.bf16.msra.mxu0 %v3819_v32  ;;  %v1120_v58 = vor.u32 %v1118_v5, %v1116_v51  ;;  %v4338_v32 = vrot.slane %v1122_v53, 1 }
  0xa7   : > { %3543 = vmatprep.subr.bf16.mxu1 %v3820_v2  ;;  %3591 = vmatprep.subr.bf16.mxu0 %v3821_v3 }
  0xa8   : > { %v4342_v59 = vsel %vm977_vm0, %v1120_v58, %v4338_v32  ;;  %v1128_v53 = vor.u32 %v1126_v40, %v4338_v32 }
  0xaa   : > { %3544 = vmatpush3.bf16.msra.mxu1 %v3820_v2  ;;  %3592 = vmatpush3.bf16.msra.mxu0 %v3821_v3  ;;  %v3824_v2 = vld [vmem:[%s4751_s1 + $0x170] sm:$0xff]   ;;  %v3838_v3 = vld [vmem:[%s4751_s1 + $0x200] sm:$0xff]  }
  0xab   : > { %3625 = vmatprep.subr.bf16.mxu1 %v3822_v20  ;;  %3673 = vmatprep.subr.bf16.mxu0 %v3823_v4 }
  0xac   : > { %3466 = vmatmul.mubr.bf16.gmra.mxu1 %v4274_v60  ;;  %3514 = vmatmul.mubr.bf16.gmra.mxu0 %v4300_v24 }
  0xad   : > { %3469 = vmatprep.mubr.bf16.mxu1 %v4278_v63  ;;  %3517 = vmatprep.mubr.bf16.mxu0 %v4304_v26 }
  0xb4   : > { %3470 = vmatmul.mubr.bf16.gmra.mxu1 %v4300_v24  ;;  %3518 = vmatmul.mubr.bf16.gmra.mxu0 %v4314_v39 }
  0xb5   : > { %3473 = vmatprep.mubr.bf16.mxu1 %v4304_v26  ;;  %3521 = vmatprep.mubr.bf16.mxu0 %v4318_v41 }
  0xbc   : > { %3474 = vmatmul.mubr.bf16.gmra.mxu1 %v4314_v39  ;;  %3522 = vmatmul.mubr.bf16.gmra.mxu0 %v4327_v27 }
  0xbd   : > { %3477 = vmatprep.mubr.bf16.mxu1 %v4318_v41  ;;  %3525 = vmatprep.mubr.bf16.mxu0 %v4332_v54 }
  0xc4   : > { %3478 = vmatmul.mubr.bf16.gmra.mxu1 %v4327_v27  ;;  %3526 = vmatmul.mubr.bf16.gmra.mxu0 %v4342_v59 }
  0xc5   : > { %3545 = vmatprep.mubr.bf16.mxu1 %v4073_v10  ;;  %3593 = vmatprep.mubr.bf16.mxu0 %v4128_v36  ;;  %v3825_v10 = vld [vmem:[%s4751_s1 + $0x230] sm:$0xff]   ;;  %v3831_v36 = vld [vmem:[%s4751_s1 + $0x218] sm:$0xff]  }
  0xcc   : > { %3546 = vmatmul.mubr.bf16.vlgmr.msra.gmra.mxu1 %v4076_v12  ;;  %3594 = vmatmul.mubr.bf16.vlgmr.msra.gmra.mxu0 %v1849_v0  ;;  %v3828_v12 = vld [vmem:[%s4751_s1 + $0x160] sm:$0xff]   ;;  %v1134_v0 = vshrl.u32 %v4212_v23, 16 }
  0xcd   : > { %3626 = vmatpush3.bf16.msra.mxu1 %v3822_v20  ;;  %3674 = vmatpush3.bf16.msra.mxu0 %v3823_v4  ;;  %v4419_v20 = vsel %vm1844_vm1, %v1862_v57, %v1864_v17  ;;  %v4422_v4 = vsel %vm1844_vm1, %v1864_v17, %v1866_v8 }
  0xce   : > { %3549 = vmatprep.mubr.bf16.mxu1 %v4082_v15  ;;  %3597 = vmatprep.mubr.bf16.mxu0 %v4355_v1  ;;  %v3829_v15 = vld [vmem:[%s4751_s1 + $0x220] sm:$0xff]  }
  0xcf   : > { %3627 = vmatprep.subr.bf16.mxu1 %v3824_v2  ;;  %3675 = vmatprep.subr.bf16.mxu0 %v3825_v10 }
  0xd1   : > { %3628 = vmatpush3.bf16.msra.mxu1 %v3824_v2  ;;  %3676 = vmatpush3.bf16.msra.mxu0 %v3825_v10  ;;  %v1159_v2 = vshll.u32 %v4453_v50, 16 }
  0xd2   : > { %3629 = vmatprep.subr.bf16.mxu1 %v3826_v11  ;;  %3677 = vmatprep.subr.bf16.mxu0 %v3827_v14 }
  0xd4   : > { %3550 = vmatmul.mubr.bf16.gmra.mxu1 %v4085_v18  ;;  %3598 = vmatmul.mubr.bf16.gmra.mxu0 %v4141_v42  ;;  %v3832_v18 = vld [vmem:[%s4751_s1 + $0x150] sm:$0xff]  }
  0xd5   : > { %3553 = vmatprep.mubr.bf16.mxu1 %v4089_v19  ;;  %3601 = vmatprep.mubr.bf16.mxu0 %v4146_v16  ;;  %v3833_v19 = vld [vmem:[%s4751_s1 + $0x210] sm:$0xff]  }
  0xd6   : > { %3630 = vmatpush3.bf16.msra.mxu1 %v3826_v11  ;;  %3678 = vmatpush3.bf16.msra.mxu0 %v3827_v14 }
  0xd7   : > { %3631 = vmatprep.subr.bf16.mxu1 %v3828_v12  ;;  %3679 = vmatprep.subr.bf16.mxu0 %v3829_v15 }
  0xda   : > { %3632 = vmatpush3.bf16.msra.mxu1 %v3828_v12  ;;  %3680 = vmatpush3.bf16.msra.mxu0 %v3829_v15  ;;  %v1161_v15 = vrot.slane %v1159_v2, 1 }
  0xdb   : > { %3633 = vmatprep.subr.bf16.mxu1 %v3830_v33  ;;  %3681 = vmatprep.subr.bf16.mxu0 %v3831_v36 }
  0xdc   : > { %3554 = vmatmul.mubr.bf16.gmra.mxu1 %v4274_v60  ;;  %3602 = vmatmul.mubr.bf16.gmra.mxu0 %v4149_v47  ;;  %v3835_v60 = vld [vmem:[%s4751_s1 + $0x208] sm:$0xff]  }
  0xdd   : > { %3557 = vmatprep.mubr.bf16.mxu1 %v4278_v63  ;;  %3605 = vmatprep.mubr.bf16.mxu0 %v4163_v21  ;;  %v3837_v63 = vld [vmem:[%s4751_s1 + $0x140] sm:$0xff]  }
  0xde   : > { %3634 = vmatpush3.bf16.msra.mxu1 %v3830_v33  ;;  %3682 = vmatpush3.bf16.msra.mxu0 %v3831_v36  ;;  %v1876_v33 = vrot.slane %v4016_v46, 1  ;;  %v1882_v46 = vrot.slane %v4212_v23, 1 }
  0xdf   : > { %3635 = vmatprep.subr.bf16.mxu1 %v3832_v18  ;;  %3683 = vmatprep.subr.bf16.mxu0 %v3833_v19 }
  0xe2   : > { %3636 = vmatpush3.bf16.msra.mxu1 %v3832_v18  ;;  %3684 = vmatpush3.bf16.msra.mxu0 %v3833_v19 }
  0xe3   : > { %3637 = vmatprep.subr.bf16.mxu1 %v3834_v37  ;;  %3685 = vmatprep.subr.bf16.mxu0 %v3835_v60 }
  0xe4   : > { %3558 = vmatmul.mubr.bf16.gmra.mxu1 %v4300_v24  ;;  %3606 = vmatmul.mubr.bf16.gmra.mxu0 %v4173_v56 }
  0xe5   : > { %3561 = vmatprep.mubr.bf16.mxu1 %v4304_v26  ;;  %3609 = vmatprep.mubr.bf16.mxu0 %v4189_v44 }
  0xe6   : > { %3638 = vmatpush3.bf16.msra.mxu1 %v3834_v37  ;;  %3686 = vmatpush3.bf16.msra.mxu0 %v3835_v60 }
  0xe7   : > { %3639 = vmatprep.subr.bf16.mxu1 %v3837_v63  ;;  %3687 = vmatprep.subr.bf16.mxu0 %v3838_v3 }
  0xea   : > { %3640 = vmatpush3.bf16.msra.mxu1 %v3837_v63  ;;  %3688 = vmatpush3.bf16.msra.mxu0 %v3838_v3 }
  0xec   : > { %v3307_v61 = vpop.f32.mrf.mxu0  ;;  %v3323_v24 = vpop.f32.mrf.mxu1  ;;  %3562 = vmatmul.mubr.bf16.gmra.mxu1 %v4314_v39  ;;  %3610 = vmatmul.mubr.bf16.gmra.mxu0 %v4419_v20  ;;  %v4442_v39 = vsel %vm1844_vm1, %v1868_v48, %v1870_v31 }
  0xed   : > { %3565 = vmatprep.mubr.bf16.mxu1 %v4318_v41  ;;  %3613 = vmatprep.mubr.bf16.mxu0 %v4422_v4  ;;  %v1130_v41 = vshll.u32 %v4212_v23, 16 }
  0xee   : > { %v4429_v26 = vpop.f32.mrf.mxu0  ;;  %v4431_v57 = vpop.f32.mrf.mxu1 }
  0xef   : > { %v1132_v58 = vrot.slane %v1130_v41, 1 }
  0xf0   : > { %v3308_v28 = vpop.f32.mrf.mxu0  ;;  %v3324_v22 = vpop.f32.mrf.mxu1 }
  0xf1   : > { %v1133_v11 = vsel %vm977_vm0, %v1128_v53, %v1132_v58  ;;  %v1136_v12 = vor.u32 %v1134_v0, %v1132_v58 }
  0xf2   : > { %v4437_v35 = vpop.f32.mrf.mxu0  ;;  %v4439_v30 = vpop.f32.mrf.mxu1 }
  0xf3   : > { %v1165_v60 = vsel %vm1164_vm3, %v1136_v12, %v1161_v15 }
  0xf4   : > { %v3311_v9 = vpop.f32.mrf.mxu0  ;;  %v3327_v43 = vpop.f32.mrf.mxu1  ;;  %3566 = vmatmul.mubr.bf16.gmra.mxu1 %v4327_v27  ;;  %3614 = vmatmul.mubr.bf16.gmra.mxu0 %v4435_v34  ;;  %v1874_v27 = vrot.slane %v4000_v38, 1 }
  0xf5   : > { %3569 = vmatprep.mubr.bf16.mxu1 %v4332_v54  ;;  %3617 = vmatprep.mubr.bf16.mxu0 %v4442_v39  ;;  %v4462_v54 = vsel %vm1844_vm1, %v1870_v31, %v1872_v49 }
  0xf6   : > { %v4455_v51 = vpop.f32.mrf.mxu0  ;;  %v4457_v5 = vpop.f32.mrf.mxu1  ;;  %v4472_v32 = vsel %vm1844_vm1, %v1872_v49, %v1874_v27 }
  0xf8   : > { %v3312_v52 = vpop.f32.mrf.mxu0  ;;  %v3328_v6 = vpop.f32.mrf.mxu1 }
  0xfa   : > { %v4466_v55 = vpop.f32.mrf.mxu0  ;;  %v4468_v10 = vpop.f32.mrf.mxu1 }
  0xfc   : > { %v3315_v38 = vpop.f32.mrf.mxu0  ;;  %v3331_v14 = vpop.f32.mrf.mxu1  ;;  %3570 = vmatmul.mubr.bf16.gmra.mxu1 %v4342_v59  ;;  %3618 = vmatmul.mubr.bf16.gmra.mxu0 %v4462_v54  ;;  %v4484_v59 = vsel %vm1844_vm1, %v1874_v27, %v1876_v33 }
  0xfd   : > { %3573 = vmatprep.mubr.bf16.mxu1 %v1133_v11  ;;  %3621 = vmatprep.mubr.bf16.mxu0 %v4472_v32 }
  0xfe   : > { %v451_v36 = vpop.f32.mrf.mxu0  ;;  %v4478_v18 = vpop.f32.mrf.mxu1 }
 0x100   : > { %v3316_v19 = vpop.f32.mrf.mxu0  ;;  %v3332_v37 = vpop.f32.mrf.mxu1 }
 0x102   : > { %v454_v63 = vpop.f32.mrf.mxu0  ;;  %v4486_v3 = vpop.f32.mrf.mxu1 }
 0x104   : > { %v3319_v13 = vpop.f32.mrf.mxu0  ;;  %v3335_v17 = vpop.f32.mrf.mxu1  ;;  %3574 = vmatmul.mubr.bf16.gmra.mxu1 %v1165_v60  ;;  %3622 = vmatmul.mubr.bf16.gmra.mxu0 %v4484_v59 }
 0x105   : > { %3641 = vmatprep.mubr.bf16.mxu1 %v4355_v1  ;;  %3689 = vmatprep.mubr.bf16.mxu0 %v4146_v16 }
 0x106   : > { %v465_v7 = vpop.f32.mrf.mxu0  ;;  %v4491_v8 = vpop.f32.mrf.mxu1 }
 0x108   : > { %v3320_v61 = vpop.f32.mrf.mxu0  ;;  %v3336_v24 = vpop.f32.mrf.mxu1 }
 0x10a   : > { %v4493_v25 = vpop.f32.mrf.mxu0  ;;  %v4495_v48 = vpop.f32.mrf.mxu1 }
 0x10c   : > { %v3355_v29 = vpop.f32.mrf.mxu1  ;;  %v3403_v31 = vpop.f32.mrf.mxu0  ;;  %3642 = vmatmul.mubr.bf16.vlgmr.msra.gmra.mxu1 %v4141_v42  ;;  %3690 = vmatmul.mubr.bf16.vlgmr.msra.gmra.mxu0 %v4149_v47 }
 0x10d   : > { %3645 = vmatprep.mubr.bf16.mxu1 %v4146_v16  ;;  %3693 = vmatprep.mubr.bf16.mxu0 %v4163_v21 }
 0x10e   : > { %v628_v1 = vpop.f32.mrf.mxu1  ;;  %v850_v28 = vpop.f32.mrf.mxu0 }
 0x10f   : > { %v629_v22 = vadd.f32 %v628_v1, %v4429_v26 }
 0x110   : > { %v3356_v40 = vpop.f32.mrf.mxu1  ;;  %v3404_v41 = vpop.f32.mrf.mxu0 }
 0x111   : > { %v4502_v9 = vadd.f32 %v850_v28, %v629_v22 }
 0x112   : > { %v631_v43 = vpop.f32.mrf.mxu1  ;;  %v853_v45 = vpop.f32.mrf.mxu0 }
 0x113   : > { %v632_v49 = vadd.f32 %v631_v43, %v4437_v35  ;;  %v3845_v43 = vld [vmem:[%s3897_s23 + $0x88] sm:$0xff]  }
 0x114   : > { %v3359_v53 = vpop.f32.mrf.mxu1  ;;  %v3407_v42 = vpop.f32.mrf.mxu0  ;;  %3646 = vmatmul.mubr.bf16.gmra.mxu1 %v4149_v47  ;;  %3694 = vmatmul.mubr.bf16.gmra.mxu0 %v4173_v56 }
 0x115   : > { %v4507_v16 = vadd.f32 %v853_v45, %v632_v49  ;;  %3649 = vmatprep.mubr.bf16.mxu1 %v4163_v21  ;;  %3697 = vmatprep.mubr.bf16.mxu0 %v4189_v44  ;;  %v1878_v45 = vrot.slane %v3845_v43, 1 }
 0x116   : > { %v642_v26 = vpop.f32.mrf.mxu1  ;;  %v864_v58 = vpop.f32.mrf.mxu0 }
 0x117   : > { %v643_v27 = vadd.f32 %v642_v26, %v4455_v51 }
 0x118   : > { %v3360_v52 = vpop.f32.mrf.mxu1  ;;  %v3408_v6 = vpop.f32.mrf.mxu0 }
 0x119   : > { %v4512_v0 = vadd.f32 %v864_v58, %v643_v27  ;;  %v1879_v58 = vsel %vm1844_vm1, %v1876_v33, %v1878_v45 }
 0x11a   : > { %v645_v35 = vpop.f32.mrf.mxu1  ;;  %v867_v2 = vpop.f32.mrf.mxu0 }
 0x11b   : > { %v646_v47 = vadd.f32 %v645_v35, %v4466_v55 }
 0x11c   : > { %v3363_v11 = vpop.f32.mrf.mxu1  ;;  %v3411_v38 = vpop.f32.mrf.mxu0  ;;  %3650 = vmatmul.mubr.bf16.gmra.mxu1 %v4173_v56  ;;  %3698 = vmatmul.mubr.bf16.gmra.mxu0 %v4419_v20 }
 0x11d   : > { %v4517_v21 = vadd.f32 %v867_v2, %v646_v47  ;;  %3653 = vmatprep.mubr.bf16.mxu1 %v4189_v44  ;;  %3701 = vmatprep.mubr.bf16.mxu0 %v4422_v4 }
 0x11e   : > { %v656_v51 = vpop.f32.mrf.mxu1  ;;  %v878_v14 = vpop.f32.mrf.mxu0 }
 0x11f   : > { %v657_v12 = vadd.f32 %v656_v51, %v451_v36 }
 0x120   : > { %v3364_v15 = vpop.f32.mrf.mxu1  ;;  %v3412_v19 = vpop.f32.mrf.mxu0 }
 0x121   : > { %v4521_v37 = vadd.f32 %v878_v14, %v657_v12 }
 0x122   : > { %v659_v55 = vpop.f32.mrf.mxu1  ;;  %v881_v60 = vpop.f32.mrf.mxu0 }
 0x123   : > { %v660_v13 = vadd.f32 %v659_v55, %v454_v63 }
 0x124   : > { %v3367_v17 = vpop.f32.mrf.mxu1  ;;  %v3415_v56 = vpop.f32.mrf.mxu0  ;;  %3654 = vmatmul.mubr.bf16.gmra.mxu1 %v4419_v20  ;;  %3702 = vmatmul.mubr.bf16.gmra.mxu0 %v4435_v34 }
 0x125   : > { %v4525_v61 = vadd.f32 %v881_v60, %v660_v13  ;;  %3657 = vmatprep.mubr.bf16.mxu1 %v4422_v4  ;;  %3705 = vmatprep.mubr.bf16.mxu0 %v4442_v39 }
 0x126   : > { %v670_v44 = vpop.f32.mrf.mxu1  ;;  %v892_v36 = vpop.f32.mrf.mxu0 }
 0x127   : > { %v671_v24 = vadd.f32 %v670_v44, %v465_v7 }
 0x128   : > { %v3368_v29 = vpop.f32.mrf.mxu1  ;;  %v3416_v31 = vpop.f32.mrf.mxu0 }
 0x129   : > { %v4529_v1 = vadd.f32 %v892_v36, %v671_v24 }
 0x12a   : > { %v673_v63 = vpop.f32.mrf.mxu1  ;;  %v895_v28 = vpop.f32.mrf.mxu0 }
 0x12b   : > { %v674_v20 = vadd.f32 %v673_v63, %v4493_v25 }
 0x12c   : > { %v3371_v22 = vpop.f32.mrf.mxu1  ;;  %v3419_v40 = vpop.f32.mrf.mxu0  ;;  %3658 = vmatmul.mubr.bf16.gmra.mxu1 %v4435_v34  ;;  %3706 = vmatmul.mubr.bf16.gmra.mxu0 %v4462_v54 }
 0x12d   : > { %v4534_v4 = vadd.f32 %v895_v28, %v674_v20  ;;  %3661 = vmatprep.mubr.bf16.mxu1 %v4442_v39  ;;  %3709 = vmatprep.mubr.bf16.mxu0 %v4472_v32 }
 0x12e   : > { %v684_v7 = vpop.f32.mrf.mxu1  ;;  %v906_v41 = vpop.f32.mrf.mxu0 }
 0x12f   : > { %v685_v49 = vadd.f32 %v684_v7, %v4431_v57  ;;  %v1880_v57 = vrot.slane %v4202_v62, 1 }
 0x130   : > { %v3372_v53 = vpop.f32.mrf.mxu1  ;;  %v3420_v25 = vpop.f32.mrf.mxu0 }
 0x131   : > { %v4540_v42 = vadd.f32 %v906_v41, %v685_v49  ;;  %v1883_v14 = vsel %vm1844_vm1, %v1880_v57, %v1882_v46 }
 0x132   : > { %v687_v26 = vpop.f32.mrf.mxu1  ;;  %v909_v34 = vpop.f32.mrf.mxu0 }
 0x133   : > { %v688_v39 = vadd.f32 %v687_v26, %v4439_v30 }
 0x134   : > { %v3375_v27 = vpop.f32.mrf.mxu1  ;;  %v3423_v52 = vpop.f32.mrf.mxu0  ;;  %3662 = vmatmul.mubr.bf16.gmra.mxu1 %v4462_v54  ;;  %3710 = vmatmul.mubr.bf16.gmra.mxu0 %v4484_v59  ;;  %v1881_v54 = vsel %vm1844_vm1, %v1878_v45, %v1880_v57 }
 0x135   : > { %v4548_v6 = vadd.f32 %v909_v34, %v688_v39  ;;  %3665 = vmatprep.mubr.bf16.mxu1 %v4472_v32  ;;  %3713 = vmatprep.mubr.bf16.mxu0 %v1879_v58 }
 0x136   : > { %v698_v35 = vpop.f32.mrf.mxu1  ;;  %v920_v2 = vpop.f32.mrf.mxu0 }
 0x137   : > { %v699_v33 = vadd.f32 %v698_v35, %v4457_v5  ;;  %v1903_v5 = vrot.slane %v4453_v50, 1 }
 0x138   : > { %v3376_v30 = vpop.f32.mrf.mxu1  ;;  %v3424_v47 = vpop.f32.mrf.mxu0 }
 0x139   : > { %v4554_v11 = vadd.f32 %v920_v2, %v699_v33 }
 0x13a   : > { %v701_v38 = vpop.f32.mrf.mxu1  ;;  %v923_v51 = vpop.f32.mrf.mxu0 }
 0x13b   : > { %v702_v32 = vadd.f32 %v701_v38, %v4468_v10  ;;  %v1907_v10 = vsel %vm1844_vm1, %v1882_v46, %v1903_v5 }
 0x13c   : > { %v3379_v12 = vpop.f32.mrf.mxu1  ;;  %v3427_v62 = vpop.f32.mrf.mxu0  ;;  %3666 = vmatmul.mubr.bf16.gmra.mxu1 %v4484_v59  ;;  %3714 = vmatmul.mubr.bf16.gmra.mxu0 %v1881_v54 }
 0x13d   : > { %v4560_v23 = vadd.f32 %v923_v51, %v702_v32  ;;  %3669 = vmatprep.mubr.bf16.mxu1 %v1879_v58  ;;  %3717 = vmatprep.mubr.bf16.mxu0 %v1883_v14 }
 0x13e   : > { %v712_v15 = vpop.f32.mrf.mxu1  ;;  %v934_v19 = vpop.f32.mrf.mxu0 }
 0x13f   : > { %v713_v55 = vadd.f32 %v712_v15, %v4478_v18 }
 0x140   : > { %v3380_v60 = vpop.f32.mrf.mxu1  ;;  %v3428_v13 = vpop.f32.mrf.mxu0 }
 0x141   : > { %v4564_v17 = vadd.f32 %v934_v19, %v713_v55 }
 0x142   : > { %v715_v56 = vpop.f32.mrf.mxu1  ;;  %v937_v44 = vpop.f32.mrf.mxu0 }
 0x143   : > { %v716_v59 = vadd.f32 %v715_v56, %v4486_v3 }
 0x144   : > { %v3383_v36 = vpop.f32.mrf.mxu1  ;;  %v3431_v24 = vpop.f32.mrf.mxu0  ;;  %3670 = vmatmul.mubr.bf16.gmra.mxu1 %v1881_v54  ;;  %3718 = vmatmul.mubr.bf16.gmra.mxu0 %v1907_v10 }
 0x145   : > { %v4568_v29 = vadd.f32 %v937_v44, %v716_v59 }
 0x146   : > { %v726_v50 = vpop.f32.mrf.mxu1  ;;  %v948_v31 = vpop.f32.mrf.mxu0 }
 0x147   : > { %v727_v18 = vadd.f32 %v726_v50, %v4491_v8 }
 0x148   : > { %v3384_v63 = vpop.f32.mrf.mxu1  ;;  %v3432_v28 = vpop.f32.mrf.mxu0 }
 0x149   : > { %v4571_v20 = vadd.f32 %v948_v31, %v727_v18 }
 0x14a   : > { %v729_v22 = vpop.f32.mrf.mxu1  ;;  %v951_v40 = vpop.f32.mrf.mxu0 }
 0x14b   : > { %v730_v7 = vadd.f32 %v729_v22, %v4495_v48 }
 0x14c   : > { %v3451_v41 = vpop.f32.mrf.mxu1  ;;  %v3499_v3 = vpop.f32.mrf.mxu0 }
 0x14d   : > { %v4574_v43 = vadd.f32 %v951_v40, %v730_v7 }
 0x14e   : > { %v1265_v45 = vpop.f32.mrf.mxu1  ;;  %v1491_v49 = vpop.f32.mrf.mxu0 }
 0x14f   : > { %v1376_v53 = vadd.f32 %v1265_v45, %v4502_v9 }
 0x150   : > { %v3452_v25 = vpop.f32.mrf.mxu1  ;;  %v3500_v26 = vpop.f32.mrf.mxu0 }
 0x151   : > { %v4577_v34 = vadd.f32 %v1491_v49, %v1376_v53 }
 0x152   : > { %v1268_v8 = vpop.f32.mrf.mxu1  ;;  %v1494_v58 = vpop.f32.mrf.mxu0 }
 0x153   : > { %v1377_v39 = vadd.f32 %v1268_v8, %v4507_v16 }
 0x154   : > { %v3455_v27 = vpop.f32.mrf.mxu1  ;;  %v3503_v52 = vpop.f32.mrf.mxu0 }
 0x155   : > { %v4580_v57 = vadd.f32 %v1494_v58, %v1377_v39 }
 0x156   : > { %v1279_v48 = vpop.f32.mrf.mxu1  ;;  %v1505_v35 = vpop.f32.mrf.mxu0 }
 0x157   : > { %v1378_v2 = vadd.f32 %v1279_v48, %v4512_v0 }
 0x158   : > { %v3456_v46 = vpop.f32.mrf.mxu1  ;;  %v3504_v33 = vpop.f32.mrf.mxu0 }
 0x159   : > { %v4583_v30 = vadd.f32 %v1505_v35, %v1378_v2 }
 0x15a   : > { %v1282_v9 = vpop.f32.mrf.mxu1  ;;  %v1508_v47 = vpop.f32.mrf.mxu0 }
 0x15b   : > { %v1379_v54 = vadd.f32 %v1282_v9, %v4517_v21 }
 0x15c   : > { %v3459_v38 = vpop.f32.mrf.mxu1  ;;  %v3507_v51 = vpop.f32.mrf.mxu0 }
 0x15d   : > { %v4586_v14 = vadd.f32 %v1508_v47, %v1379_v54 }
 0x15e   : > { %v1293_v16 = vpop.f32.mrf.mxu1  ;;  %v1519_v32 = vpop.f32.mrf.mxu0 }
 0x15f   : > { %v1380_v12 = vadd.f32 %v1293_v16, %v4521_v37 }
 0x160   : > { %v3460_v62 = vpop.f32.mrf.mxu1  ;;  %v3508_v5 = vpop.f32.mrf.mxu0 }
 0x161   : > { %v4589_v15 = vadd.f32 %v1519_v32, %v1380_v12 }
 0x162   : > { %v1296_v0 = vpop.f32.mrf.mxu1  ;;  %v1522_v19 = vpop.f32.mrf.mxu0 }
 0x163   : > { %v1381_v55 = vadd.f32 %v1296_v0, %v4525_v61 }
 0x164   : > { %v3463_v60 = vpop.f32.mrf.mxu1  ;;  %v3511_v13 = vpop.f32.mrf.mxu0 }
 0x165   : > { %v4592_v10 = vadd.f32 %v1522_v19, %v1381_v55 }
 0x166   : > { %v1307_v21 = vpop.f32.mrf.mxu1  ;;  %v1533_v56 = vpop.f32.mrf.mxu0 }
 0x167   : > { %v1382_v44 = vadd.f32 %v1307_v21, %v4529_v1 }
 0x168   : > { %v3464_v59 = vpop.f32.mrf.mxu1  ;;  %v3512_v36 = vpop.f32.mrf.mxu0 }
 0x169   : > { %v4595_v24 = vadd.f32 %v1533_v56, %v1382_v44 }
 0x16a   : > { %v1310_v37 = vpop.f32.mrf.mxu1  ;;  %v1536_v50 = vpop.f32.mrf.mxu0 }
 0x16b   : > { %v1383_v31 = vadd.f32 %v1310_v37, %v4534_v4 }
 0x16c   : > { %v3467_v18 = vpop.f32.mrf.mxu1  ;;  %v3515_v63 = vpop.f32.mrf.mxu0 }
 0x16d   : > { %v4598_v28 = vadd.f32 %v1536_v50, %v1383_v31 }
 0x16e   : > { %v1321_v61 = vpop.f32.mrf.mxu1  ;;  %v1547_v22 = vpop.f32.mrf.mxu0 }
 0x16f   : > { %v1384_v40 = vadd.f32 %v1321_v61, %v4540_v42 }
 0x170   : > { %v3468_v7 = vpop.f32.mrf.mxu1  ;;  %v3516_v41 = vpop.f32.mrf.mxu0 }
 0x171   : > { %v4601_v3 = vadd.f32 %v1547_v22, %v1384_v40 }
 0x172   : > { %v1324_v1 = vpop.f32.mrf.mxu1  ;;  %v1550_v45 = vpop.f32.mrf.mxu0 }
 0x173   : > { %v1385_v49 = vadd.f32 %v1324_v1, %v4548_v6 }
 0x174   : > { %v3471_v53 = vpop.f32.mrf.mxu1  ;;  %v3519_v25 = vpop.f32.mrf.mxu0 }
 0x175   : > { %v4604_v26 = vadd.f32 %v1550_v45, %v1385_v49 }
 0x176   : > { %v1335_v4 = vpop.f32.mrf.mxu1  ;;  %v1561_v8 = vpop.f32.mrf.mxu0 }
 0x177   : > { %v1386_v58 = vadd.f32 %v1335_v4, %v4554_v11 }
 0x178   : > { %v3472_v39 = vpop.f32.mrf.mxu1  ;;  %v3520_v27 = vpop.f32.mrf.mxu0 }
 0x179   : > { %v4607_v52 = vadd.f32 %v1561_v8, %v1386_v58 }
 0x17a   : > { %v1338_v42 = vpop.f32.mrf.mxu1  ;;  %v1564_v48 = vpop.f32.mrf.mxu0 }
 0x17b   : > { %v1387_v35 = vadd.f32 %v1338_v42, %v4560_v23 }
 0x17c   : > { %v3475_v2 = vpop.f32.mrf.mxu1  ;;  %v3523_v46 = vpop.f32.mrf.mxu0 }
 0x17d   : > { %v4610_v33 = vadd.f32 %v1564_v48, %v1387_v35 }
 0x17e   : > { %v1349_v6 = vpop.f32.mrf.mxu1  ;;  %v1575_v9 = vpop.f32.mrf.mxu0 }
 0x17f   : > { %v1388_v47 = vadd.f32 %v1349_v6, %v4564_v17 }
 0x180   : > { %v3476_v54 = vpop.f32.mrf.mxu1  ;;  %v3524_v38 = vpop.f32.mrf.mxu0 }
 0x181   : > { %v4613_v51 = vadd.f32 %v1575_v9, %v1388_v47 }
 0x182   : > { %v1352_v11 = vpop.f32.mrf.mxu1  ;;  %v1578_v16 = vpop.f32.mrf.mxu0 }
 0x183   : > { %v1389_v32 = vadd.f32 %v1352_v11, %v4568_v29 }
 0x184   : > { %v3479_v12 = vpop.f32.mrf.mxu1  ;;  %v3527_v62 = vpop.f32.mrf.mxu0 }
 0x185   : > { %v4616_v5 = vadd.f32 %v1578_v16, %v1389_v32 }
 0x186   : > { %v1363_v23 = vpop.f32.mrf.mxu1  ;;  %v1589_v0 = vpop.f32.mrf.mxu0 }
 0x187   : > { %v1390_v19 = vadd.f32 %v1363_v23, %v4571_v20 }
 0x188   : > { %v3480_v55 = vpop.f32.mrf.mxu1  ;;  %v3528_v60 = vpop.f32.mrf.mxu0 }
 0x189   : > { %v4619_v13 = vadd.f32 %v1589_v0, %v1390_v19 }
 0x18a   : > { %v1366_v17 = vpop.f32.mrf.mxu1  ;;  %v1592_v21 = vpop.f32.mrf.mxu0 }
 0x18b   : > { %v1391_v56 = vadd.f32 %v1366_v17, %v4574_v43 }
 0x18c   : > { %v3547_v44 = vpop.f32.mrf.mxu1  ;;  %v3595_v59 = vpop.f32.mrf.mxu0 }
 0x18d   : > { %v4622_v36 = vadd.f32 %v1592_v21, %v1391_v56 }
 0x18e   : > { %v1717_v29 = vpop.f32.mrf.mxu1  ;;  %v2008_v37 = vpop.f32.mrf.mxu0 }
 0x18f   : > { %v1828_v50 = vadd.f32 %v1717_v29, %v4577_v34 }
 0x190   : > { %v3548_v31 = vpop.f32.mrf.mxu1  ;;  %v3596_v18 = vpop.f32.mrf.mxu0 }
 0x191   : > { %v4625_v63 = vadd.f32 %v2008_v37, %v1828_v50 }
 0x192   : > { %v4627_v20 = vpop.f32.mrf.mxu1  ;;  %v4629_v61 = vpop.f32.mrf.mxu0 }
 0x194   : > { %v3551_v22 = vpop.f32.mrf.mxu1  ;;  %v3599_v40 = vpop.f32.mrf.mxu0 }
 0x196   : > { %v1731_v7 = vpop.f32.mrf.mxu1  ;;  %v2022_v43 = vpop.f32.mrf.mxu0 }
 0x197   : > { %v1830_v41 = vadd.f32 %v1731_v7, %v4583_v30 }
 0x198   : > { %v3552_v1 = vpop.f32.mrf.mxu1  ;;  %v3600_v45 = vpop.f32.mrf.mxu0 }
 0x199   : > { %v4632_v49 = vadd.f32 %v2022_v43, %v1830_v41 }
 0x19a   : > { %v4634_v53 = vpop.f32.mrf.mxu1  ;;  %v4636_v34 = vpop.f32.mrf.mxu0 }
 0x19c   : > { %v3555_v25 = vpop.f32.mrf.mxu1  ;;  %v3603_v4 = vpop.f32.mrf.mxu0 }
 0x19e   : > { %v1745_v8 = vpop.f32.mrf.mxu1  ;;  %v2036_v58 = vpop.f32.mrf.mxu0 }
 0x19f   : > { %v1832_v39 = vadd.f32 %v1745_v8, %v4589_v15 }
 0x1a0   : > { %v3556_v27 = vpop.f32.mrf.mxu1  ;;  %v3604_v42 = vpop.f32.mrf.mxu0 }
 0x1a1   : > { %v4639_v48 = vadd.f32 %v2036_v58, %v1832_v39 }
 0x1a2   : > { %v4641_v35 = vpop.f32.mrf.mxu1  ;;  %v4643_v30 = vpop.f32.mrf.mxu0 }
 0x1a4   : > { %v3559_v2 = vpop.f32.mrf.mxu1  ;;  %v3607_v46 = vpop.f32.mrf.mxu0 }
 0x1a6   : > { %v1759_v6 = vpop.f32.mrf.mxu1  ;;  %v2050_v9 = vpop.f32.mrf.mxu0 }
 0x1a7   : > { %v1834_v47 = vadd.f32 %v1759_v6, %v4595_v24 }
 0x1a8   : > { %v3560_v54 = vpop.f32.mrf.mxu1  ;;  %v3608_v38 = vpop.f32.mrf.mxu0 }
 0x1a9   : > { %v4646_v11 = vadd.f32 %v2050_v9, %v1834_v47  ;;  %v1829_v38 = vadd.f32 %v4627_v20, %v4580_v57  ;;  %v1831_v20 = vadd.f32 %v4634_v53, %v4586_v14 }
 0x1aa   : > { %v4648_v16 = vpop.f32.mrf.mxu1  ;;  %v4650_v15 = vpop.f32.mrf.mxu0 }
 0x1ac   : > { %v3563_v32 = vpop.f32.mrf.mxu1  ;;  %v3611_v12 = vpop.f32.mrf.mxu0 }
 0x1ae   : > { %v1773_v62 = vpop.f32.mrf.mxu1  ;;  %v2064_v23 = vpop.f32.mrf.mxu0 }
 0x1af   : > { %v1836_v0 = vadd.f32 %v1773_v62, %v4601_v3 }
 0x1b0   : > { %v3564_v19 = vpop.f32.mrf.mxu1  ;;  %v3612_v55 = vpop.f32.mrf.mxu0 }
 0x1b1   : > { %v4653_v60 = vadd.f32 %v2064_v23, %v1836_v0  ;;  %v2120_v0 = vadd.f32 %v4629_v61, %v1829_v38  ;;  %v4687_v55 = vld [vmem:[%s4752_s2] ss:$0 sm:$0xff] }
 0x1b2   : > { %v4655_v17 = vpop.f32.mrf.mxu1  ;;  %v4657_v24 = vpop.f32.mrf.mxu0 }
 0x1b4   : > { %v3567_v21 = vpop.f32.mrf.mxu1  ;;  %v3615_v56 = vpop.f32.mrf.mxu0 }
 0x1b6   : > { %v1787_v44 = vpop.f32.mrf.mxu1  ;;  %v2078_v59 = vpop.f32.mrf.mxu0 }
 0x1b7   : > { %v1838_v29 = vadd.f32 %v1787_v44, %v4607_v52 }
 0x1b8   : > { %v3568_v37 = vpop.f32.mrf.mxu1  ;;  %v3616_v50 = vpop.f32.mrf.mxu0 }
 0x1b9   : > { %v4660_v31 = vadd.f32 %v2078_v59, %v1838_v29 }
 0x1ba   : > { %v4662_v18 = vpop.f32.mrf.mxu1  ;;  %v4664_v3 = vpop.f32.mrf.mxu0 }
 0x1bc   : > { %v3571_v22 = vpop.f32.mrf.mxu1  ;;  %v3619_v40 = vpop.f32.mrf.mxu0 }
 0x1be   : > { %v1801_v7 = vpop.f32.mrf.mxu1  ;;  %v2092_v43 = vpop.f32.mrf.mxu0 }
 0x1bf   : > { %v1840_v41 = vadd.f32 %v1801_v7, %v4613_v51 }
 0x1c0   : > { %v3572_v1 = vpop.f32.mrf.mxu1  ;;  %v3620_v45 = vpop.f32.mrf.mxu0 }
 0x1c1   : > { %v4667_v25 = vadd.f32 %v2092_v43, %v1840_v41  ;;  %v2122_v43 = vadd.f32 %v4636_v34, %v1831_v20 }
 0x1c2   : > { %v4669_v4 = vpop.f32.mrf.mxu1  ;;  %v4671_v52 = vpop.f32.mrf.mxu0 }
 0x1c4   : > { %v3575_v8 = vpop.f32.mrf.mxu1  ;;  %v3623_v58 = vpop.f32.mrf.mxu0 }
 0x1c6   : > { %v1815_v39 = vpop.f32.mrf.mxu1  ;;  %v2106_v27 = vpop.f32.mrf.mxu0 }
 0x1c7   : > { %v1842_v42 = vadd.f32 %v1815_v39, %v4619_v13 }
 0x1c8   : > { %v3576_v2 = vpop.f32.mrf.mxu1  ;;  %v3624_v46 = vpop.f32.mrf.mxu0 }
 0x1c9   : > { %v4674_v6 = vadd.f32 %v2106_v27, %v1842_v42 }
 0x1ca   : > { %v4676_v9 = vpop.f32.mrf.mxu1  ;;  %v4678_v51 = vpop.f32.mrf.mxu0 }
 0x1cc   : > { %v3643_v47 = vpop.f32.mrf.mxu1  ;;  %v3691_v54 = vpop.f32.mrf.mxu0 }
 0x1ce   : > { %v2234_v32 = vpop.f32.mrf.mxu1  ;;  %v2460_v12 = vpop.f32.mrf.mxu0 }
 0x1cf   : > { %v2345_v62 = vadd.f32 %v2234_v32, %v4625_v63 }
 0x1d0   : > { %v3644_v23 = vpop.f32.mrf.mxu1  ;;  %v3692_v13 = vpop.f32.mrf.mxu0 }
 0x1d1   : > { %v2571_v19 = vadd.f32 %v2460_v12, %v2345_v62 }
 0x1d2   : > { %v2237_v21 = vpop.f32.mrf.mxu1  ;;  %v2463_v56 = vpop.f32.mrf.mxu0 }
 0x1d3   : > { %v2346_v44 = vadd.f32 %v2237_v21, %v2120_v0  ;;  %v2594_v63 = vadd.f32 %v4687_v55, %v2571_v19 }
 0x1d4   : > { %v3647_v59 = vpop.f32.mrf.mxu1  ;;  %v3695_v57 = vpop.f32.mrf.mxu0 }
 0x1d5   : > { %v2572_v29 = vadd.f32 %v2463_v56, %v2346_v44  ;;  %v2610_v41 = vmax.f32 %v2594_v63, 0.0  ;;  %v1835_v44 = vadd.f32 %v4648_v16, %v4598_v28 }
 0x1d6   : > { %v2248_v37 = vpop.f32.mrf.mxu1  ;;  %v2474_v50 = vpop.f32.mrf.mxu0 }
 0x1d7   : > { %v2595_v61 = vadd.f32 %v4687_v55, %v2572_v29  ;;  %v2347_v22 = vadd.f32 %v2248_v37, %v4632_v49  ;;  %v1833_v49 = vadd.f32 %v4641_v35, %v4592_v10 }
 0x1d8   : > { %v3648_v40 = vpop.f32.mrf.mxu1  ;;  %v3696_v7 = vpop.f32.mrf.mxu0 }
 0x1d9   : > { %v2611_v1 = vmax.f32 %v2595_v61, 0.0  ;;  %v2573_v45 = vadd.f32 %v2474_v50, %v2347_v22  ;;  %v2124_v12 = vadd.f32 %v4643_v30, %v1833_v49  ;;  %v2126_v50 = vadd.f32 %v4650_v15, %v1835_v44 }
 0x1da   : > { %v2251_v14 = vpop.f32.mrf.mxu1  ;;  %v2477_v53 = vpop.f32.mrf.mxu0 }
 0x1db   : > { %v3029_v8 = vpack.c.bf16 %v2611_v1, %v2610_v41  ;;  %v2348_v58 = vadd.f32 %v2251_v14, %v2122_v43  ;;  %v2596_v34 = vadd.f32 %v4687_v55, %v2573_v45  ;;  %v1837_v45 = vadd.f32 %v4655_v17, %v4604_v26 }
 0x1dc   : > { %v3651_v39 = vpop.f32.mrf.mxu1  ;;  %v3699_v27 = vpop.f32.mrf.mxu0 }
 0x1dd   : > { %3030 = vst [vmem:[%s4699_s21] sm:$0xff] %v3029_v8   ;;  %v2574_v42 = vadd.f32 %v2477_v53, %v2348_v58  ;;  %v2612_v62 = vmax.f32 %v2596_v34, 0.0  ;;  %v2128_v49 = vadd.f32 %v4657_v24, %v1837_v45  ;;  %v1843_v45 = vadd.f32 %v4676_v9, %v4622_v36 }
 0x1de   : > { %v2262_v2 = vpop.f32.mrf.mxu1  ;;  %v2488_v46 = vpop.f32.mrf.mxu0 }
 0x1df   : > { %v2597_v47 = vadd.f32 %v4687_v55, %v2574_v42  ;;  %v2349_v54 = vadd.f32 %v2262_v2, %v4639_v48 }
 0x1e0   : > { %v3652_v38 = vpop.f32.mrf.mxu1  ;;  %v3700_v32 = vpop.f32.mrf.mxu0 }
 0x1e1   : > { %v2613_v23 = vmax.f32 %v2597_v47, 0.0  ;;  %v2575_v13 = vadd.f32 %v2488_v46, %v2349_v54  ;;  %v1839_v32 = vadd.f32 %v4662_v18, %v4610_v33 }
 0x1e2   : > { %v2265_v0 = vpop.f32.mrf.mxu1  ;;  %v2491_v10 = vpop.f32.mrf.mxu0 }
 0x1e3   : > { %v3034_v35 = vpack.c.bf16 %v2613_v23, %v2612_v62  ;;  %v2350_v19 = vadd.f32 %v2265_v0, %v2124_v12  ;;  %v2598_v59 = vadd.f32 %v4687_v55, %v2575_v13 }
 0x1e4   : > { %v3655_v21 = vpop.f32.mrf.mxu1  ;;  %v3703_v56 = vpop.f32.mrf.mxu0 }
 0x1e5   : > { %3066 = vst [vmem:[%s4699_s21 + $0x8] sm:$0xff] %v3034_v35   ;;  %v2576_v48 = vadd.f32 %v2491_v10, %v2350_v19  ;;  %v2614_v61 = vmax.f32 %v2598_v59, 0.0  ;;  %v2130_v35 = vadd.f32 %v4664_v3, %v1839_v32 }
 0x1e6   : > { %v2276_v57 = vpop.f32.mrf.mxu1  ;;  %v2502_v20 = vpop.f32.mrf.mxu0 }
 0x1e7   : > { %v2599_v30 = vadd.f32 %v4687_v55, %v2576_v48  ;;  %v2351_v63 = vadd.f32 %v2276_v57, %v4646_v11 }
 0x1e8   : > { %v3656_v29 = vpop.f32.mrf.mxu1  ;;  %v3704_v37 = vpop.f32.mrf.mxu0 }
 0x1e9   : > { %v2615_v22 = vmax.f32 %v2599_v30, 0.0  ;;  %v2577_v40 = vadd.f32 %v2502_v20, %v2351_v63  ;;  %v1841_v20 = vadd.f32 %v4669_v4, %v4616_v5 }
 0x1ea   : > { %v2279_v7 = vpop.f32.mrf.mxu1  ;;  %v2505_v28 = vpop.f32.mrf.mxu0 }
 0x1eb   : > { %v3039_v16 = vpack.c.bf16 %v2615_v22, %v2614_v61  ;;  %v2352_v43 = vadd.f32 %v2279_v7, %v2126_v50  ;;  %v2600_v14 = vadd.f32 %v4687_v55, %v2577_v40  ;;  %v2132_v22 = vadd.f32 %v4671_v52, %v1841_v20 }
 0x1ec   : > { %v3659_v41 = vpop.f32.mrf.mxu1  ;;  %v3707_v1 = vpop.f32.mrf.mxu0 }
 0x1ed   : > { %3067 = vst [vmem:[%s4699_s21 + $0x10] sm:$0xff] %v3039_v16   ;;  %v2578_v11 = vadd.f32 %v2505_v28, %v2352_v43  ;;  %v2616_v34 = vmax.f32 %v2600_v14, 0.0 }
 0x1ee   : > { %v2290_v53 = vpop.f32.mrf.mxu1  ;;  %v2516_v8 = vpop.f32.mrf.mxu0 }
 0x1ef   : > { %v2601_v15 = vadd.f32 %v4687_v55, %v2578_v11  ;;  %v2353_v58 = vadd.f32 %v2290_v53, %v4653_v60 }
 0x1f0   : > { %v3660_v39 = vpop.f32.mrf.mxu1  ;;  %v3708_v27 = vpop.f32.mrf.mxu0 }
 0x1f1   : > { %v2617_v42 = vmax.f32 %v2601_v15, 0.0  ;;  %v2579_v2 = vadd.f32 %v2516_v8, %v2353_v58  ;;  %v2134_v39 = vadd.f32 %v4678_v51, %v1843_v45 }
 0x1f2   : > { %v2293_v46 = vpop.f32.mrf.mxu1  ;;  %v2519_v26 = vpop.f32.mrf.mxu0 }
 0x1f3   : > { %v3044_v17 = vpack.c.bf16 %v2617_v42, %v2616_v34  ;;  %v2354_v47 = vadd.f32 %v2293_v46, %v2128_v49  ;;  %v2602_v12 = vadd.f32 %v4687_v55, %v2579_v2 }
 0x1f4   : > { %v3663_v54 = vpop.f32.mrf.mxu1  ;;  %v3711_v38 = vpop.f32.mrf.mxu0 }
 0x1f5   : > { %3068 = vst [vmem:[%s4699_s21 + $0x18] sm:$0xff] %v3044_v17   ;;  %v2580_v60 = vadd.f32 %v2519_v26, %v2354_v47  ;;  %v2618_v19 = vmax.f32 %v2602_v12, 0.0 }
 0x1f6   : > { %v2304_v62 = vpop.f32.mrf.mxu1  ;;  %v2530_v23 = vpop.f32.mrf.mxu0 }
 0x1f7   : > { %v2603_v24 = vadd.f32 %v4687_v55, %v2580_v60  ;;  %v2355_v13 = vadd.f32 %v2304_v62, %v4660_v31 }
 0x1f8   : > { %v3664_v0 = vpop.f32.mrf.mxu1  ;;  %v3712_v10 = vpop.f32.mrf.mxu0 }
 0x1f9   : > { %v2619_v21 = vmax.f32 %v2603_v24, 0.0  ;;  %v2581_v56 = vadd.f32 %v2530_v23, %v2355_v13 }
 0x1fa   : > { %v2307_v44 = vpop.f32.mrf.mxu1  ;;  %v2533_v33 = vpop.f32.mrf.mxu0 }
 0x1fb   : > { %v3049_v18 = vpack.c.bf16 %v2619_v21, %v2618_v19  ;;  %v2356_v59 = vadd.f32 %v2307_v44, %v2130_v35  ;;  %v2604_v30 = vadd.f32 %v4687_v55, %v2581_v56 }
 0x1fc   : > { %v3667_v48 = vpop.f32.mrf.mxu1  ;;  %v3715_v57 = vpop.f32.mrf.mxu0 }
 0x1fd   : > { %3069 = vst [vmem:[%s4699_s21 + $0x20] sm:$0xff] %v3049_v18   ;;  %v2582_v31 = vadd.f32 %v2533_v33, %v2356_v59  ;;  %v2620_v40 = vmax.f32 %v2604_v30, 0.0 }
 0x1fe   : > { %v2318_v63 = vpop.f32.mrf.mxu1  ;;  %v2544_v29 = vpop.f32.mrf.mxu0 }
 0x1ff   : > { %v2605_v3 = vadd.f32 %v4687_v55, %v2582_v31  ;;  %v2357_v37 = vadd.f32 %v2318_v63, %v4667_v25 }
 0x200   : > { %v3668_v50 = vpop.f32.mrf.mxu1  ;;  %v3716_v61 = vpop.f32.mrf.mxu0 }
 0x201   : > { %v2621_v7 = vmax.f32 %v2605_v3, 0.0  ;;  %v2583_v28 = vadd.f32 %v2544_v29, %v2357_v37 }
 0x202   : > { %v2321_v16 = vpop.f32.mrf.mxu1  ;;  %v2547_v5 = vpop.f32.mrf.mxu0 }
 0x203   : > { %v3054_v4 = vpack.c.bf16 %v2621_v7, %v2620_v40  ;;  %v2358_v43 = vadd.f32 %v2321_v16, %v2132_v22  ;;  %v2606_v14 = vadd.f32 %v4687_v55, %v2583_v28 }
 0x204   : > { %v3671_v41 = vpop.f32.mrf.mxu1  ;;  %v3719_v1 = vpop.f32.mrf.mxu0 }
 0x205   : > { %3070 = vst [vmem:[%s4699_s21 + $0x28] sm:$0xff] %v3054_v4   ;;  %v2584_v25 = vadd.f32 %v2547_v5, %v2358_v43  ;;  %v2622_v27 = vmax.f32 %v2606_v14, 0.0 }
 0x206   : > { %v2332_v11 = vpop.f32.mrf.mxu1  ;;  %v2558_v53 = vpop.f32.mrf.mxu0 }
 0x207   : > { %v2607_v52 = vadd.f32 %v4687_v55, %v2584_v25  ;;  %v2359_v8 = vadd.f32 %v2332_v11, %v4674_v6 }
 0x208   : > { %v3672_v15 = vpop.f32.mrf.mxu1  ;;  %v3720_v58 = vpop.f32.mrf.mxu0 }
 0x209   : > { %v2623_v49 = vmax.f32 %v2607_v52, 0.0  ;;  %v2585_v34 = vadd.f32 %v2558_v53, %v2359_v8 }
 0x20a   : > { %v2335_v36 = vpop.f32.mrf.mxu1  ;;  %v2561_v2 = vpop.f32.mrf.mxu0 }
 0x20b   : > { %v3059_v9 = vpack.c.bf16 %v2623_v49, %v2622_v27  ;;  %v2360_v42 = vadd.f32 %v2335_v36, %v2134_v39  ;;  %v2608_v46 = vadd.f32 %v4687_v55, %v2585_v34 }
 0x20d   : > { %3071 = vst [vmem:[%s4699_s21 + $0x30] sm:$0xff] %v3059_v9   ;;  %v2586_v26 = vadd.f32 %v2561_v2, %v2360_v42  ;;  %v2624_v47 = vmax.f32 %v2608_v46, 0.0 }
 0x20f   : > { %v2609_v17 = vadd.f32 %v4687_v55, %v2586_v26 }
 0x211   : > { %v2625_v6 = vmax.f32 %v2609_v17, 0.0 }
 0x213   : > { %v3064_v54 = vpack.c.bf16 %v2625_v6, %v2624_v47 }
 0x215   : > { %3072 = vst [vmem:[%s4699_s21 + $0x38] sm:$0xff] %v3064_v54  }
 0x216 PF: > { %s13_s12 = sadd.s32 1, %s3852_s12  }
 0x217   : > { %p10_p4 = scmp.ge.s32.totalorder %s13_s12, 6  }
 0x219   :  { %12 = sbr.rel (!%p10_p4) target bundleno = 1 (0x1), region = 70 }

</bundles_post_ra>
